<compile_context>
chip_gen: v7x
topology: tpu7x:2x2x1
jax: 0.10.0
libtpu: 0.0.40
codegen_flags: <defaults>
</compile_context>

<pallas_src>
import jax
import jax.numpy as jnp
from jax.experimental import pallas as pl
from jax.experimental.pallas import tpu as pltpu


# ----------------------------------------------------------------------------
# Pallas kernels (channels-first, lane-dense on the point axis)
# ----------------------------------------------------------------------------
def edgeconv_max_kernel(nbr_ref, ctr_ref, wt_ref, wd_ref, b_ref, out_ref):
    # nbr_ref: (1, K, Cin, TP) bf16   gathered neighbor features
    # ctr_ref: (1, Cin, TP)    bf16   center features
    # wt_ref : (Cout, Cin)     bf16   W_top   (acts on nbr)
    # wd_ref : (Cout, Cin)     bf16   W_bot - W_top (acts on ctr)
    # b_ref  : (Cout, 1)       f32    bias
    # out_ref: (1, Cout, TP)   bf16
    K = nbr_ref.shape[1]
    ctr_term = jnp.dot(wd_ref[...], ctr_ref[0, :, :],
                       preferred_element_type=jnp.float32) + b_ref[...]
    acc = None
    for k in range(K):                                  # K small & static -> unrolled
        yk = jnp.dot(wt_ref[...], nbr_ref[0, k, :, :],
                     preferred_element_type=jnp.float32)
        yk = jnp.maximum(yk + ctr_term, 0.0)            # ReLU
        acc = yk if acc is None else jnp.maximum(acc, yk)
    out_ref[0, :, :] = acc.astype(out_ref.dtype)


def edgeconv_max_res_kernel(nbr_ref, ctr_ref, res_ref, wt_ref, wd_ref, b_ref,
                            wr_ref, out_ref):
    # Same as above plus residual 1x1 Conv1d (wr @ res) and final ReLU.
    # res_ref: (1, Cin, TP) bf16 ; wr_ref: (Cout, Cin) bf16 ; out_ref: (1, Cout, TP) f32
    K = nbr_ref.shape[1]
    ctr_term = jnp.dot(wd_ref[...], ctr_ref[0, :, :],
                       preferred_element_type=jnp.float32) + b_ref[...]
    acc = None
    for k in range(K):
        yk = jnp.dot(wt_ref[...], nbr_ref[0, k, :, :],
                     preferred_element_type=jnp.float32)
        yk = jnp.maximum(yk + ctr_term, 0.0)
        acc = yk if acc is None else jnp.maximum(acc, yk)
    resid = jnp.dot(wr_ref[...], res_ref[0, :, :],
                    preferred_element_type=jnp.float32)
    out_ref[0, :, :] = jnp.maximum(acc + resid, 0.0).astype(out_ref.dtype)


def _stage1(nbr, ctr, wt, wd, bias, *, tile_p):
    bs, K, cin, P = nbr.shape
    cout = wt.shape[0]
    return pl.pallas_call(
        edgeconv_max_kernel,
        out_shape=jax.ShapeDtypeStruct((bs, cout, P), jnp.bfloat16),
        grid=(bs, P // tile_p),
        in_specs=[
            pl.BlockSpec((1, K, cin, tile_p), lambda b, p: (b, 0, 0, p)),
            pl.BlockSpec((1, cin, tile_p), lambda b, p: (b, 0, p)),
            pl.BlockSpec((cout, cin), lambda b, p: (0, 0)),
            pl.BlockSpec((cout, cin), lambda b, p: (0, 0)),
            pl.BlockSpec((cout, 1), lambda b, p: (0, 0)),
        ],
        out_specs=pl.BlockSpec((1, cout, tile_p), lambda b, p: (b, 0, p)),
        compiler_params=pltpu.CompilerParams(
            dimension_semantics=("parallel", "parallel"),
            vmem_limit_bytes=32 * 1024 * 1024),
    )(nbr, ctr, wt, wd, bias)


def _stage2(nbr, ctr, res, wt, wd, bias, wr, *, tile_p):
    bs, K, chid, P = nbr.shape
    cin = res.shape[1]
    cout = wt.shape[0]
    return pl.pallas_call(
        edgeconv_max_res_kernel,
        out_shape=jax.ShapeDtypeStruct((bs, cout, P), jnp.float32),
        grid=(bs, P // tile_p),
        in_specs=[
            pl.BlockSpec((1, K, chid, tile_p), lambda b, p: (b, 0, 0, p)),
            pl.BlockSpec((1, chid, tile_p), lambda b, p: (b, 0, p)),
            pl.BlockSpec((1, cin, tile_p), lambda b, p: (b, 0, p)),
            pl.BlockSpec((cout, chid), lambda b, p: (0, 0)),
            pl.BlockSpec((cout, chid), lambda b, p: (0, 0)),
            pl.BlockSpec((cout, 1), lambda b, p: (0, 0)),
            pl.BlockSpec((cout, cin), lambda b, p: (0, 0)),
        ],
        out_specs=pl.BlockSpec((1, cout, tile_p), lambda b, p: (b, 0, p)),
        compiler_params=pltpu.CompilerParams(
            dimension_semantics=("parallel", "parallel"),
            vmem_limit_bytes=32 * 1024 * 1024),
    )(nbr, ctr, res, wt, wd, bias, wr)


# ----------------------------------------------------------------------------
# Glue: RadiusGraph (ball query) and channels-first neighbor gather
# ----------------------------------------------------------------------------
# TODO(synk): furthest_point_sample / gather_operation (scale_factor > 1 path)
# are CUDA extensions with no clean Pallas equivalent; scale_factor == 1 here.
def radius_graph(xyz, k, radius):
    """xyz: (bs, P, 3) -> nbr_idx (bs, P, k) int32, is_filled (bs, P, k) bool."""
    bs, P, _ = xyz.shape
    d2 = jnp.sum((xyz[:, :, None, :] - xyz[:, None, :, :]) ** 2, axis=-1)  # (bs,P,P)
    in_ball = d2 <= radius * radius
    idx = jnp.arange(P, dtype=jnp.int32)
    # ball_query semantics: first k in-ball indices, ascending index order.
    key = jnp.where(in_ball, idx[None, None, :], idx[None, None, :] + P)
    _, cand = jax.lax.top_k(-key, k)                   # k smallest keys
    cand = cand.astype(jnp.int32)
    count = jnp.sum(in_ball, axis=-1)                  # >= 1 (self distance is 0)
    is_filled = jnp.arange(k)[None, None, :] < count[..., None]
    # Pad invalid slots with the first valid neighbor: duplicates leave the max
    # aggregation unchanged, so the kernels need no mask at all.
    nbr_idx = jnp.where(is_filled, cand, cand[..., :1])
    return nbr_idx, is_filled


def _gather_neighbors_cf(feats_cf, nbr_idx):
    """feats_cf: (bs, C, P); nbr_idx: (bs, P, K) -> (bs, K, C, P) channels-first."""
    def per_batch(f, idx):
        g = jnp.take(f, idx, axis=1)            # (C, P, K)
        return jnp.transpose(g, (2, 0, 1))      # (K, C, P)
    return jax.vmap(per_batch)(feats_cf, nbr_idx)


def graph_conv_block_forward(xyz, feats, params, *, k=8, radius=0.4, tile_p=512):
    """xyz: (bs, P, 3); feats: (bs, in_dim, P) [PyTorch layout].
    Returns (bs, out_dim, P) float32."""
    bs, in_dim, P = feats.shape
    tile_p = min(tile_p, P)
    assert P % tile_p == 0 and tile_p % 128 == 0, (P, tile_p)

    nbr_idx, _ = radius_graph(xyz, k, radius)

    # bf16 activations/weights, f32 accumulation in-kernel.
    feats_bf = feats.astype(jnp.bfloat16)                       # (bs, Cin, P)
    nbr1 = _gather_neighbors_cf(feats_bf, nbr_idx)              # (bs, K, Cin, P)

    # conv1 weight W1: (2*Cin, Cout); split so the 2C edge tensor is never built.
    w1 = params["w1"]
    wt1 = w1[:in_dim].T.astype(jnp.bfloat16)                    # (Cout, Cin)
    wd1 = (w1[in_dim:] - w1[:in_dim]).T.astype(jnp.bfloat16)    # (Cout, Cin)
    b1 = params["b1"].reshape(-1, 1).astype(jnp.float32)        # (Cout, 1)

    h = _stage1(nbr1, feats_bf, wt1, wd1, b1, tile_p=tile_p)    # (bs, Cout, P) bf16
    out_dim = h.shape[1]

    # TODO(synk): optionally fuse stage 1 + gather + stage 2 around a VMEM-resident
    # h (scalar-prefetched nbr_idx) to drop this HBM round trip when P*Cout fits VMEM.
    nbr2 = _gather_neighbors_cf(h, nbr_idx)                     # (bs, K, Cout, P)
    w2 = params["w2"]
    wt2 = w2[:out_dim].T.astype(jnp.bfloat16)
    wd2 = (w2[out_dim:] - w2[:out_dim]).T.astype(jnp.bfloat16)
    b2 = params["b2"].reshape(-1, 1).astype(jnp.float32)
    wres_t = params["wres"].T.astype(jnp.bfloat16)              # (Cout, Cin)

    out = _stage2(nbr2, h, feats_bf, wt2, wd2, b2, wres_t, tile_p=tile_p)
    return out                                                  # (bs, Cout, P)


# ----------------------------------------------------------------------------
# Main
# ----------------------------------------------------------------------------
if __name__ == "__main__":
    bs, P, in_dim, out_dim, K = 2, 1024, 8, 16, 8
    radius = 0.4

    key = jax.random.PRNGKey(0)
    k_xyz, k_f, k1, k2, k3, k4, k5 = jax.random.split(key, 7)

    xyz = jax.random.uniform(k_xyz, (bs, P, 3), dtype=jnp.float32)
    feats = jax.random.normal(k_f, (bs, in_dim, P), dtype=jnp.float32)

    # Parameter shapes follow __init__:
    #   conv1: Conv2d(2*in_dim, out_dim, 1)   conv2: Conv2d(2*out_dim, out_dim, 1)
    #   res_conv: Conv1d(in_dim, out_dim, 1, bias=False)
    # PyTorch (Cout, Cin, 1, 1) weights correspond to these (Cin, Cout) matrices.
    params = {
        "w1": 0.1 * jax.random.normal(k1, (2 * in_dim, out_dim), jnp.float32),
        "b1": 0.1 * jax.random.normal(k2, (out_dim,), jnp.float32),
        "w2": 0.1 * jax.random.normal(k3, (2 * out_dim, out_dim), jnp.float32),
        "b2": 0.1 * jax.random.normal(k4, (out_dim,), jnp.float32),
        "wres": 0.1 * jax.random.normal(k5, (in_dim, out_dim), jnp.float32),
    }

    fwd = jax.jit(lambda xyz_, feats_, params_: graph_conv_block_forward(
        xyz_, feats_, params_, k=K, radius=radius, tile_p=512))
    out = jax.block_until_ready(fwd(xyz, feats, params))
    assert out.shape == (bs, out_dim, P), out.shape
    assert bool(jnp.all(jnp.isfinite(out)))
    print("KERNEL_OK")
</pallas_src>

<mosaic_0001>
module attributes {stable_mosaic.version = 11 : i64} {
  func.func @edgeconv_max_kernel(%arg0: i32, %arg1: i32, %arg2: memref<1x8x8x512xbf16, #tpu.memory_space<vmem>>, %arg3: memref<1x8x512xbf16, #tpu.memory_space<vmem>>, %arg4: memref<16x8xbf16, #tpu.memory_space<vmem>>, %arg5: memref<16x8xbf16, #tpu.memory_space<vmem>>, %arg6: memref<16x1xf32, #tpu.memory_space<vmem>>, %arg7: memref<1x16x512xbf16, #tpu.memory_space<vmem>>) attributes {dimension_semantics = [#tpu.dimension_semantics<parallel>, #tpu.dimension_semantics<parallel>], iteration_bounds = array<i64: 2, 2>, scalar_prefetch = 0 : i64, scratch_operands = 0 : i64, tpu.core_type = #tpu.core_type<tc>, window_params = [{transform_indices = @transform_0, window_bounds = array<i64: 1, 8, 8, 512>}, {transform_indices = @transform_1, window_bounds = array<i64: 1, 8, 512>}, {pipeline_mode = #tpu.pipeline_mode<synchronous>, transform_indices = @transform_2, window_bounds = array<i64: 16, 8>}, {pipeline_mode = #tpu.pipeline_mode<synchronous>, transform_indices = @transform_3, window_bounds = array<i64: 16, 8>}, {pipeline_mode = #tpu.pipeline_mode<synchronous>, transform_indices = @transform_4, window_bounds = array<i64: 16, 1>}, {transform_indices = @transform_5, window_bounds = array<i64: 1, 16, 512>}]} {
    %c0 = arith.constant 0 : index
    %c0_0 = arith.constant 0 : index
    %0 = vector.load %arg5[%c0, %c0_0] : memref<16x8xbf16, #tpu.memory_space<vmem>>, vector<16x8xbf16>
    %c0_1 = arith.constant 0 : index
    %c0_2 = arith.constant 0 : index
    %c0_3 = arith.constant 0 : index
    %1 = vector.load %arg3[%c0_1, %c0_2, %c0_3] : memref<1x8x512xbf16, #tpu.memory_space<vmem>>, vector<1x8x512xbf16>
    %2 = vector.shape_cast %1 : vector<1x8x512xbf16> to vector<8x512xbf16>
    %cst = arith.constant dense<0.000000e+00> : vector<16x512xf32>
    %3 = tpu.matmul %0, %2, %cst {dimension_numbers = #tpu.dot_dimension_numbers<[1], [0], [0], [1], [0, 0, 1, 1], [], []>} : vector<16x8xbf16>, vector<8x512xbf16>, vector<16x512xf32> -> vector<16x512xf32>
    %c0_4 = arith.constant 0 : index
    %c0_5 = arith.constant 0 : index
    %4 = vector.load %arg6[%c0_4, %c0_5] : memref<16x1xf32, #tpu.memory_space<vmem>>, vector<16x1xf32>
    %5 = vector.broadcast %4 : vector<16x1xf32> to vector<16x512xf32>
    %6 = arith.addf %3, %5 : vector<16x512xf32>
    %c0_6 = arith.constant 0 : index
    %c0_7 = arith.constant 0 : index
    %7 = vector.load %arg4[%c0_6, %c0_7] : memref<16x8xbf16, #tpu.memory_space<vmem>>, vector<16x8xbf16>
    %c0_8 = arith.constant 0 : index
    %c0_9 = arith.constant 0 : index
    %c0_10 = arith.constant 0 : index
    %c0_11 = arith.constant 0 : index
    %8 = vector.load %arg2[%c0_8, %c0_9, %c0_10, %c0_11] : memref<1x8x8x512xbf16, #tpu.memory_space<vmem>>, vector<1x1x8x512xbf16>
    %9 = vector.shape_cast %8 : vector<1x1x8x512xbf16> to vector<8x512xbf16>
    %cst_12 = arith.constant dense<0.000000e+00> : vector<16x512xf32>
    %10 = tpu.matmul %7, %9, %cst_12 {dimension_numbers = #tpu.dot_dimension_numbers<[1], [0], [0], [1], [0, 0, 1, 1], [], []>} : vector<16x8xbf16>, vector<8x512xbf16>, vector<16x512xf32> -> vector<16x512xf32>
    %11 = arith.addf %10, %6 : vector<16x512xf32>
    %cst_13 = arith.constant 0.000000e+00 : f32
    %12 = vector.broadcast %cst_13 : f32 to vector<16x512xf32>
    %13 = arith.maximumf %11, %12 : vector<16x512xf32>
    %c0_14 = arith.constant 0 : index
    %c0_15 = arith.constant 0 : index
    %14 = vector.load %arg4[%c0_14, %c0_15] : memref<16x8xbf16, #tpu.memory_space<vmem>>, vector<16x8xbf16>
    %c0_16 = arith.constant 0 : index
    %c1 = arith.constant 1 : index
    %c0_17 = arith.constant 0 : index
    %c0_18 = arith.constant 0 : index
    %15 = vector.load %arg2[%c0_16, %c1, %c0_17, %c0_18] : memref<1x8x8x512xbf16, #tpu.memory_space<vmem>>, vector<1x1x8x512xbf16>
    %16 = vector.shape_cast %15 : vector<1x1x8x512xbf16> to vector<8x512xbf16>
    %cst_19 = arith.constant dense<0.000000e+00> : vector<16x512xf32>
    %17 = tpu.matmul %14, %16, %cst_19 {dimension_numbers = #tpu.dot_dimension_numbers<[1], [0], [0], [1], [0, 0, 1, 1], [], []>} : vector<16x8xbf16>, vector<8x512xbf16>, vector<16x512xf32> -> vector<16x512xf32>
    %18 = arith.addf %17, %6 : vector<16x512xf32>
    %cst_20 = arith.constant 0.000000e+00 : f32
    %19 = vector.broadcast %cst_20 : f32 to vector<16x512xf32>
    %20 = arith.maximumf %18, %19 : vector<16x512xf32>
    %21 = arith.maximumf %13, %20 : vector<16x512xf32>
    %c0_21 = arith.constant 0 : index
    %c0_22 = arith.constant 0 : index
    %22 = vector.load %arg4[%c0_21, %c0_22] : memref<16x8xbf16, #tpu.memory_space<vmem>>, vector<16x8xbf16>
    %c0_23 = arith.constant 0 : index
    %c2 = arith.constant 2 : index
    %c0_24 = arith.constant 0 : index
    %c0_25 = arith.constant 0 : index
    %23 = vector.load %arg2[%c0_23, %c2, %c0_24, %c0_25] : memref<1x8x8x512xbf16, #tpu.memory_space<vmem>>, vector<1x1x8x512xbf16>
    %24 = vector.shape_cast %23 : vector<1x1x8x512xbf16> to vector<8x512xbf16>
    %cst_26 = arith.constant dense<0.000000e+00> : vector<16x512xf32>
    %25 = tpu.matmul %22, %24, %cst_26 {dimension_numbers = #tpu.dot_dimension_numbers<[1], [0], [0], [1], [0, 0, 1, 1], [], []>} : vector<16x8xbf16>, vector<8x512xbf16>, vector<16x512xf32> -> vector<16x512xf32>
    %26 = arith.addf %25, %6 : vector<16x512xf32>
    %cst_27 = arith.constant 0.000000e+00 : f32
    %27 = vector.broadcast %cst_27 : f32 to vector<16x512xf32>
    %28 = arith.maximumf %26, %27 : vector<16x512xf32>
    %29 = arith.maximumf %21, %28 : vector<16x512xf32>
    %c0_28 = arith.constant 0 : index
    %c0_29 = arith.constant 0 : index
    %30 = vector.load %arg4[%c0_28, %c0_29] : memref<16x8xbf16, #tpu.memory_space<vmem>>, vector<16x8xbf16>
    %c0_30 = arith.constant 0 : index
    %c3 = arith.constant 3 : index
    %c0_31 = arith.constant 0 : index
    %c0_32 = arith.constant 0 : index
    %31 = vector.load %arg2[%c0_30, %c3, %c0_31, %c0_32] : memref<1x8x8x512xbf16, #tpu.memory_space<vmem>>, vector<1x1x8x512xbf16>
    %32 = vector.shape_cast %31 : vector<1x1x8x512xbf16> to vector<8x512xbf16>
    %cst_33 = arith.constant dense<0.000000e+00> : vector<16x512xf32>
    %33 = tpu.matmul %30, %32, %cst_33 {dimension_numbers = #tpu.dot_dimension_numbers<[1], [0], [0], [1], [0, 0, 1, 1], [], []>} : vector<16x8xbf16>, vector<8x512xbf16>, vector<16x512xf32> -> vector<16x512xf32>
    %34 = arith.addf %33, %6 : vector<16x512xf32>
    %cst_34 = arith.constant 0.000000e+00 : f32
    %35 = vector.broadcast %cst_34 : f32 to vector<16x512xf32>
    %36 = arith.maximumf %34, %35 : vector<16x512xf32>
    %37 = arith.maximumf %29, %36 : vector<16x512xf32>
    %c0_35 = arith.constant 0 : index
    %c0_36 = arith.constant 0 : index
    %38 = vector.load %arg4[%c0_35, %c0_36] : memref<16x8xbf16, #tpu.memory_space<vmem>>, vector<16x8xbf16>
    %c0_37 = arith.constant 0 : index
    %c4 = arith.constant 4 : index
    %c0_38 = arith.constant 0 : index
    %c0_39 = arith.constant 0 : index
    %39 = vector.load %arg2[%c0_37, %c4, %c0_38, %c0_39] : memref<1x8x8x512xbf16, #tpu.memory_space<vmem>>, vector<1x1x8x512xbf16>
    %40 = vector.shape_cast %39 : vector<1x1x8x512xbf16> to vector<8x512xbf16>
    %cst_40 = arith.constant dense<0.000000e+00> : vector<16x512xf32>
    %41 = tpu.matmul %38, %40, %cst_40 {dimension_numbers = #tpu.dot_dimension_numbers<[1], [0], [0], [1], [0, 0, 1, 1], [], []>} : vector<16x8xbf16>, vector<8x512xbf16>, vector<16x512xf32> -> vector<16x512xf32>
    %42 = arith.addf %41, %6 : vector<16x512xf32>
    %cst_41 = arith.constant 0.000000e+00 : f32
    %43 = vector.broadcast %cst_41 : f32 to vector<16x512xf32>
    %44 = arith.maximumf %42, %43 : vector<16x512xf32>
    %45 = arith.maximumf %37, %44 : vector<16x512xf32>
    %c0_42 = arith.constant 0 : index
    %c0_43 = arith.constant 0 : index
    %46 = vector.load %arg4[%c0_42, %c0_43] : memref<16x8xbf16, #tpu.memory_space<vmem>>, vector<16x8xbf16>
    %c0_44 = arith.constant 0 : index
    %c5 = arith.constant 5 : index
    %c0_45 = arith.constant 0 : index
    %c0_46 = arith.constant 0 : index
    %47 = vector.load %arg2[%c0_44, %c5, %c0_45, %c0_46] : memref<1x8x8x512xbf16, #tpu.memory_space<vmem>>, vector<1x1x8x512xbf16>
    %48 = vector.shape_cast %47 : vector<1x1x8x512xbf16> to vector<8x512xbf16>
    %cst_47 = arith.constant dense<0.000000e+00> : vector<16x512xf32>
    %49 = tpu.matmul %46, %48, %cst_47 {dimension_numbers = #tpu.dot_dimension_numbers<[1], [0], [0], [1], [0, 0, 1, 1], [], []>} : vector<16x8xbf16>, vector<8x512xbf16>, vector<16x512xf32> -> vector<16x512xf32>
    %50 = arith.addf %49, %6 : vector<16x512xf32>
    %cst_48 = arith.constant 0.000000e+00 : f32
    %51 = vector.broadcast %cst_48 : f32 to vector<16x512xf32>
    %52 = arith.maximumf %50, %51 : vector<16x512xf32>
    %53 = arith.maximumf %45, %52 : vector<16x512xf32>
    %c0_49 = arith.constant 0 : index
    %c0_50 = arith.constant 0 : index
    %54 = vector.load %arg4[%c0_49, %c0_50] : memref<16x8xbf16, #tpu.memory_space<vmem>>, vector<16x8xbf16>
    %c0_51 = arith.constant 0 : index
    %c6 = arith.constant 6 : index
    %c0_52 = arith.constant 0 : index
    %c0_53 = arith.constant 0 : index
    %55 = vector.load %arg2[%c0_51, %c6, %c0_52, %c0_53] : memref<1x8x8x512xbf16, #tpu.memory_space<vmem>>, vector<1x1x8x512xbf16>
    %56 = vector.shape_cast %55 : vector<1x1x8x512xbf16> to vector<8x512xbf16>
    %cst_54 = arith.constant dense<0.000000e+00> : vector<16x512xf32>
    %57 = tpu.matmul %54, %56, %cst_54 {dimension_numbers = #tpu.dot_dimension_numbers<[1], [0], [0], [1], [0, 0, 1, 1], [], []>} : vector<16x8xbf16>, vector<8x512xbf16>, vector<16x512xf32> -> vector<16x512xf32>
    %58 = arith.addf %57, %6 : vector<16x512xf32>
    %cst_55 = arith.constant 0.000000e+00 : f32
    %59 = vector.broadcast %cst_55 : f32 to vector<16x512xf32>
    %60 = arith.maximumf %58, %59 : vector<16x512xf32>
    %61 = arith.maximumf %53, %60 : vector<16x512xf32>
    %c0_56 = arith.constant 0 : index
    %c0_57 = arith.constant 0 : index
    %62 = vector.load %arg4[%c0_56, %c0_57] : memref<16x8xbf16, #tpu.memory_space<vmem>>, vector<16x8xbf16>
    %c0_58 = arith.constant 0 : index
    %c7 = arith.constant 7 : index
    %c0_59 = arith.constant 0 : index
    %c0_60 = arith.constant 0 : index
    %63 = vector.load %arg2[%c0_58, %c7, %c0_59, %c0_60] : memref<1x8x8x512xbf16, #tpu.memory_space<vmem>>, vector<1x1x8x512xbf16>
    %64 = vector.shape_cast %63 : vector<1x1x8x512xbf16> to vector<8x512xbf16>
    %cst_61 = arith.constant dense<0.000000e+00> : vector<16x512xf32>
    %65 = tpu.matmul %62, %64, %cst_61 {dimension_numbers = #tpu.dot_dimension_numbers<[1], [0], [0], [1], [0, 0, 1, 1], [], []>} : vector<16x8xbf16>, vector<8x512xbf16>, vector<16x512xf32> -> vector<16x512xf32>
    %66 = arith.addf %65, %6 : vector<16x512xf32>
    %cst_62 = arith.constant 0.000000e+00 : f32
    %67 = vector.broadcast %cst_62 : f32 to vector<16x512xf32>
    %68 = arith.maximumf %66, %67 : vector<16x512xf32>
    %69 = arith.maximumf %61, %68 : vector<16x512xf32>
    %70 = arith.truncf %69 : vector<16x512xf32> to vector<16x512xbf16>
    %c0_63 = arith.constant 0 : index
    %c0_64 = arith.constant 0 : index
    %c0_65 = arith.constant 0 : index
    %71 = vector.load %arg7[%c0_63, %c0_64, %c0_65] : memref<1x16x512xbf16, #tpu.memory_space<vmem>>, vector<1x16x512xbf16>
    %72 = vector.shape_cast %71 : vector<1x16x512xbf16> to vector<16x512xbf16>
    %73 = vector.shape_cast %70 : vector<16x512xbf16> to vector<1x16x512xbf16>
    tpu.vector_store %arg7[%c0_63, %c0_64, %c0_65], %73 {strides = array<i32>} : memref<1x16x512xbf16, #tpu.memory_space<vmem>>, vector<1x16x512xbf16>,
    return
  }
  func.func @transform_0(%arg0: i32, %arg1: i32) -> (i32, i32, i32, i32) {
    %c0_i32 = arith.constant 0 : i32
    %c0_i32_0 = arith.constant 0 : i32
    %c0_i32_1 = arith.constant 0 : i32
    return %arg0, %c0_i32, %c0_i32_0, %arg1 : i32, i32, i32, i32
  }
  func.func @transform_1(%arg0: i32, %arg1: i32) -> (i32, i32, i32) {
    %c0_i32 = arith.constant 0 : i32
    %c0_i32_0 = arith.constant 0 : i32
    return %arg0, %c0_i32, %arg1 : i32, i32, i32
  }
  func.func @transform_2(%arg0: i32, %arg1: i32) -> (i32, i32) {
    %c0_i32 = arith.constant 0 : i32
    %c0_i32_0 = arith.constant 0 : i32
    %c0_i32_1 = arith.constant 0 : i32
    return %c0_i32, %c0_i32_0 : i32, i32
  }
  func.func @transform_3(%arg0: i32, %arg1: i32) -> (i32, i32) {
    %c0_i32 = arith.constant 0 : i32
    %c0_i32_0 = arith.constant 0 : i32
    %c0_i32_1 = arith.constant 0 : i32
    return %c0_i32, %c0_i32_0 : i32, i32
  }
  func.func @transform_4(%arg0: i32, %arg1: i32) -> (i32, i32) {
    %c0_i32 = arith.constant 0 : i32
    %c0_i32_0 = arith.constant 0 : i32
    %c0_i32_1 = arith.constant 0 : i32
    return %c0_i32, %c0_i32_0 : i32, i32
  }
  func.func @transform_5(%arg0: i32, %arg1: i32) -> (i32, i32, i32) {
    %c0_i32 = arith.constant 0 : i32
    %c0_i32_0 = arith.constant 0 : i32
    return %arg0, %c0_i32, %arg1 : i32, i32, i32
  }
}

module attributes {stable_mosaic.version = 11 : i64} {
  func.func @edgeconv_max_res_kernel(%arg0: i32, %arg1: i32, %arg2: memref<1x8x16x512xbf16, #tpu.memory_space<vmem>>, %arg3: memref<1x16x512xbf16, #tpu.memory_space<vmem>>, %arg4: memref<1x8x512xbf16, #tpu.memory_space<vmem>>, %arg5: memref<16x16xbf16, #tpu.memory_space<vmem>>, %arg6: memref<16x16xbf16, #tpu.memory_space<vmem>>, %arg7: memref<16x1xf32, #tpu.memory_space<vmem>>, %arg8: memref<16x8xbf16, #tpu.memory_space<vmem>>, %arg9: memref<1x16x512xf32, #tpu.memory_space<vmem>>) attributes {dimension_semantics = [#tpu.dimension_semantics<parallel>, #tpu.dimension_semantics<parallel>], iteration_bounds = array<i64: 2, 2>, scalar_prefetch = 0 : i64, scratch_operands = 0 : i64, tpu.core_type = #tpu.core_type<tc>, window_params = [{transform_indices = @transform_0, window_bounds = array<i64: 1, 8, 16, 512>}, {transform_indices = @transform_1, window_bounds = array<i64: 1, 16, 512>}, {transform_indices = @transform_2, window_bounds = array<i64: 1, 8, 512>}, {pipeline_mode = #tpu.pipeline_mode<synchronous>, transform_indices = @transform_3, window_bounds = array<i64: 16, 16>}, {pipeline_mode = #tpu.pipeline_mode<synchronous>, transform_indices = @transform_4, window_bounds = array<i64: 16, 16>}, {pipeline_mode = #tpu.pipeline_mode<synchronous>, transform_indices = @transform_5, window_bounds = array<i64: 16, 1>}, {pipeline_mode = #tpu.pipeline_mode<synchronous>, transform_indices = @transform_6, window_bounds = array<i64: 16, 8>}, {transform_indices = @transform_7, window_bounds = array<i64: 1, 16, 512>}]} {
    %c0 = arith.constant 0 : index
    %c0_0 = arith.constant 0 : index
    %0 = vector.load %arg6[%c0, %c0_0] : memref<16x16xbf16, #tpu.memory_space<vmem>>, vector<16x16xbf16>
    %c0_1 = arith.constant 0 : index
    %c0_2 = arith.constant 0 : index
    %c0_3 = arith.constant 0 : index
    %1 = vector.load %arg3[%c0_1, %c0_2, %c0_3] : memref<1x16x512xbf16, #tpu.memory_space<vmem>>, vector<1x16x512xbf16>
    %2 = vector.shape_cast %1 : vector<1x16x512xbf16> to vector<16x512xbf16>
    %cst = arith.constant dense<0.000000e+00> : vector<16x512xf32>
    %3 = tpu.matmul %0, %2, %cst {dimension_numbers = #tpu.dot_dimension_numbers<[1], [0], [0], [1], [0, 0, 1, 1], [], []>} : vector<16x16xbf16>, vector<16x512xbf16>, vector<16x512xf32> -> vector<16x512xf32>
    %c0_4 = arith.constant 0 : index
    %c0_5 = arith.constant 0 : index
    %4 = vector.load %arg7[%c0_4, %c0_5] : memref<16x1xf32, #tpu.memory_space<vmem>>, vector<16x1xf32>
    %5 = vector.broadcast %4 : vector<16x1xf32> to vector<16x512xf32>
    %6 = arith.addf %3, %5 : vector<16x512xf32>
    %c0_6 = arith.constant 0 : index
    %c0_7 = arith.constant 0 : index
    %7 = vector.load %arg5[%c0_6, %c0_7] : memref<16x16xbf16, #tpu.memory_space<vmem>>, vector<16x16xbf16>
    %c0_8 = arith.constant 0 : index
    %c0_9 = arith.constant 0 : index
    %c0_10 = arith.constant 0 : index
    %c0_11 = arith.constant 0 : index
    %8 = vector.load %arg2[%c0_8, %c0_9, %c0_10, %c0_11] : memref<1x8x16x512xbf16, #tpu.memory_space<vmem>>, vector<1x1x16x512xbf16>
    %9 = vector.shape_cast %8 : vector<1x1x16x512xbf16> to vector<16x512xbf16>
    %cst_12 = arith.constant dense<0.000000e+00> : vector<16x512xf32>
    %10 = tpu.matmul %7, %9, %cst_12 {dimension_numbers = #tpu.dot_dimension_numbers<[1], [0], [0], [1], [0, 0, 1, 1], [], []>} : vector<16x16xbf16>, vector<16x512xbf16>, vector<16x512xf32> -> vector<16x512xf32>
    %11 = arith.addf %10, %6 : vector<16x512xf32>
    %cst_13 = arith.constant 0.000000e+00 : f32
    %12 = vector.broadcast %cst_13 : f32 to vector<16x512xf32>
    %13 = arith.maximumf %11, %12 : vector<16x512xf32>
    %c0_14 = arith.constant 0 : index
    %c0_15 = arith.constant 0 : index
    %14 = vector.load %arg5[%c0_14, %c0_15] : memref<16x16xbf16, #tpu.memory_space<vmem>>, vector<16x16xbf16>
    %c0_16 = arith.constant 0 : index
    %c1 = arith.constant 1 : index
    %c0_17 = arith.constant 0 : index
    %c0_18 = arith.constant 0 : index
    %15 = vector.load %arg2[%c0_16, %c1, %c0_17, %c0_18] : memref<1x8x16x512xbf16, #tpu.memory_space<vmem>>, vector<1x1x16x512xbf16>
    %16 = vector.shape_cast %15 : vector<1x1x16x512xbf16> to vector<16x512xbf16>
    %cst_19 = arith.constant dense<0.000000e+00> : vector<16x512xf32>
    %17 = tpu.matmul %14, %16, %cst_19 {dimension_numbers = #tpu.dot_dimension_numbers<[1], [0], [0], [1], [0, 0, 1, 1], [], []>} : vector<16x16xbf16>, vector<16x512xbf16>, vector<16x512xf32> -> vector<16x512xf32>
    %18 = arith.addf %17, %6 : vector<16x512xf32>
    %cst_20 = arith.constant 0.000000e+00 : f32
    %19 = vector.broadcast %cst_20 : f32 to vector<16x512xf32>
    %20 = arith.maximumf %18, %19 : vector<16x512xf32>
    %21 = arith.maximumf %13, %20 : vector<16x512xf32>
    %c0_21 = arith.constant 0 : index
    %c0_22 = arith.constant 0 : index
    %22 = vector.load %arg5[%c0_21, %c0_22] : memref<16x16xbf16, #tpu.memory_space<vmem>>, vector<16x16xbf16>
    %c0_23 = arith.constant 0 : index
    %c2 = arith.constant 2 : index
    %c0_24 = arith.constant 0 : index
    %c0_25 = arith.constant 0 : index
    %23 = vector.load %arg2[%c0_23, %c2, %c0_24, %c0_25] : memref<1x8x16x512xbf16, #tpu.memory_space<vmem>>, vector<1x1x16x512xbf16>
    %24 = vector.shape_cast %23 : vector<1x1x16x512xbf16> to vector<16x512xbf16>
    %cst_26 = arith.constant dense<0.000000e+00> : vector<16x512xf32>
    %25 = tpu.matmul %22, %24, %cst_26 {dimension_numbers = #tpu.dot_dimension_numbers<[1], [0], [0], [1], [0, 0, 1, 1], [], []>} : vector<16x16xbf16>, vector<16x512xbf16>, vector<16x512xf32> -> vector<16x512xf32>
    %26 = arith.addf %25, %6 : vector<16x512xf32>
    %cst_27 = arith.constant 0.000000e+00 : f32
    %27 = vector.broadcast %cst_27 : f32 to vector<16x512xf32>
    %28 = arith.maximumf %26, %27 : vector<16x512xf32>
    %29 = arith.maximumf %21, %28 : vector<16x512xf32>
    %c0_28 = arith.constant 0 : index
    %c0_29 = arith.constant 0 : index
    %30 = vector.load %arg5[%c0_28, %c0_29] : memref<16x16xbf16, #tpu.memory_space<vmem>>, vector<16x16xbf16>
    %c0_30 = arith.constant 0 : index
    %c3 = arith.constant 3 : index
    %c0_31 = arith.constant 0 : index
    %c0_32 = arith.constant 0 : index
    %31 = vector.load %arg2[%c0_30, %c3, %c0_31, %c0_32] : memref<1x8x16x512xbf16, #tpu.memory_space<vmem>>, vector<1x1x16x512xbf16>
    %32 = vector.shape_cast %31 : vector<1x1x16x512xbf16> to vector<16x512xbf16>
    %cst_33 = arith.constant dense<0.000000e+00> : vector<16x512xf32>
    %33 = tpu.matmul %30, %32, %cst_33 {dimension_numbers = #tpu.dot_dimension_numbers<[1], [0], [0], [1], [0, 0, 1, 1], [], []>} : vector<16x16xbf16>, vector<16x512xbf16>, vector<16x512xf32> -> vector<16x512xf32>
    %34 = arith.addf %33, %6 : vector<16x512xf32>
    %cst_34 = arith.constant 0.000000e+00 : f32
    %35 = vector.broadcast %cst_34 : f32 to vector<16x512xf32>
    %36 = arith.maximumf %34, %35 : vector<16x512xf32>
    %37 = arith.maximumf %29, %36 : vector<16x512xf32>
    %c0_35 = arith.constant 0 : index
    %c0_36 = arith.constant 0 : index
    %38 = vector.load %arg5[%c0_35, %c0_36] : memref<16x16xbf16, #tpu.memory_space<vmem>>, vector<16x16xbf16>
    %c0_37 = arith.constant 0 : index
    %c4 = arith.constant 4 : index
    %c0_38 = arith.constant 0 : index
    %c0_39 = arith.constant 0 : index
    %39 = vector.load %arg2[%c0_37, %c4, %c0_38, %c0_39] : memref<1x8x16x512xbf16, #tpu.memory_space<vmem>>, vector<1x1x16x512xbf16>
    %40 = vector.shape_cast %39 : vector<1x1x16x512xbf16> to vector<16x512xbf16>
    %cst_40 = arith.constant dense<0.000000e+00> : vector<16x512xf32>
    %41 = tpu.matmul %38, %40, %cst_40 {dimension_numbers = #tpu.dot_dimension_numbers<[1], [0], [0], [1], [0, 0, 1, 1], [], []>} : vector<16x16xbf16>, vector<16x512xbf16>, vector<16x512xf32> -> vector<16x512xf32>
    %42 = arith.addf %41, %6 : vector<16x512xf32>
    %cst_41 = arith.constant 0.000000e+00 : f32
    %43 = vector.broadcast %cst_41 : f32 to vector<16x512xf32>
    %44 = arith.maximumf %42, %43 : vector<16x512xf32>
    %45 = arith.maximumf %37, %44 : vector<16x512xf32>
    %c0_42 = arith.constant 0 : index
    %c0_43 = arith.constant 0 : index
    %46 = vector.load %arg5[%c0_42, %c0_43] : memref<16x16xbf16, #tpu.memory_space<vmem>>, vector<16x16xbf16>
    %c0_44 = arith.constant 0 : index
    %c5 = arith.constant 5 : index
    %c0_45 = arith.constant 0 : index
    %c0_46 = arith.constant 0 : index
    %47 = vector.load %arg2[%c0_44, %c5, %c0_45, %c0_46] : memref<1x8x16x512xbf16, #tpu.memory_space<vmem>>, vector<1x1x16x512xbf16>
    %48 = vector.shape_cast %47 : vector<1x1x16x512xbf16> to vector<16x512xbf16>
    %cst_47 = arith.constant dense<0.000000e+00> : vector<16x512xf32>
    %49 = tpu.matmul %46, %48, %cst_47 {dimension_numbers = #tpu.dot_dimension_numbers<[1], [0], [0], [1], [0, 0, 1, 1], [], []>} : vector<16x16xbf16>, vector<16x512xbf16>, vector<16x512xf32> -> vector<16x512xf32>
    %50 = arith.addf %49, %6 : vector<16x512xf32>
    %cst_48 = arith.constant 0.000000e+00 : f32
    %51 = vector.broadcast %cst_48 : f32 to vector<16x512xf32>
    %52 = arith.maximumf %50, %51 : vector<16x512xf32>
    %53 = arith.maximumf %45, %52 : vector<16x512xf32>
    %c0_49 = arith.constant 0 : index
    %c0_50 = arith.constant 0 : index
    %54 = vector.load %arg5[%c0_49, %c0_50] : memref<16x16xbf16, #tpu.memory_space<vmem>>, vector<16x16xbf16>
    %c0_51 = arith.constant 0 : index
    %c6 = arith.constant 6 : index
    %c0_52 = arith.constant 0 : index
    %c0_53 = arith.constant 0 : index
    %55 = vector.load %arg2[%c0_51, %c6, %c0_52, %c0_53] : memref<1x8x16x512xbf16, #tpu.memory_space<vmem>>, vector<1x1x16x512xbf16>
    %56 = vector.shape_cast %55 : vector<1x1x16x512xbf16> to vector<16x512xbf16>
    %cst_54 = arith.constant dense<0.000000e+00> : vector<16x512xf32>
    %57 = tpu.matmul %54, %56, %cst_54 {dimension_numbers = #tpu.dot_dimension_numbers<[1], [0], [0], [1], [0, 0, 1, 1], [], []>} : vector<16x16xbf16>, vector<16x512xbf16>, vector<16x512xf32> -> vector<16x512xf32>
    %58 = arith.addf %57, %6 : vector<16x512xf32>
    %cst_55 = arith.constant 0.000000e+00 : f32
    %59 = vector.broadcast %cst_55 : f32 to vector<16x512xf32>
    %60 = arith.maximumf %58, %59 : vector<16x512xf32>
    %61 = arith.maximumf %53, %60 : vector<16x512xf32>
    %c0_56 = arith.constant 0 : index
    %c0_57 = arith.constant 0 : index
    %62 = vector.load %arg5[%c0_56, %c0_57] : memref<16x16xbf16, #tpu.memory_space<vmem>>, vector<16x16xbf16>
    %c0_58 = arith.constant 0 : index
    %c7 = arith.constant 7 : index
    %c0_59 = arith.constant 0 : index
    %c0_60 = arith.constant 0 : index
    %63 = vector.load %arg2[%c0_58, %c7, %c0_59, %c0_60] : memref<1x8x16x512xbf16, #tpu.memory_space<vmem>>, vector<1x1x16x512xbf16>
    %64 = vector.shape_cast %63 : vector<1x1x16x512xbf16> to vector<16x512xbf16>
    %cst_61 = arith.constant dense<0.000000e+00> : vector<16x512xf32>
    %65 = tpu.matmul %62, %64, %cst_61 {dimension_numbers = #tpu.dot_dimension_numbers<[1], [0], [0], [1], [0, 0, 1, 1], [], []>} : vector<16x16xbf16>, vector<16x512xbf16>, vector<16x512xf32> -> vector<16x512xf32>
    %66 = arith.addf %65, %6 : vector<16x512xf32>
    %cst_62 = arith.constant 0.000000e+00 : f32
    %67 = vector.broadcast %cst_62 : f32 to vector<16x512xf32>
    %68 = arith.maximumf %66, %67 : vector<16x512xf32>
    %69 = arith.maximumf %61, %68 : vector<16x512xf32>
    %c0_63 = arith.constant 0 : index
    %c0_64 = arith.constant 0 : index
    %70 = vector.load %arg8[%c0_63, %c0_64] : memref<16x8xbf16, #tpu.memory_space<vmem>>, vector<16x8xbf16>
    %c0_65 = arith.constant 0 : index
    %c0_66 = arith.constant 0 : index
    %c0_67 = arith.constant 0 : index
    %71 = vector.load %arg4[%c0_65, %c0_66, %c0_67] : memref<1x8x512xbf16, #tpu.memory_space<vmem>>, vector<1x8x512xbf16>
    %72 = vector.shape_cast %71 : vector<1x8x512xbf16> to vector<8x512xbf16>
    %cst_68 = arith.constant dense<0.000000e+00> : vector<16x512xf32>
    %73 = tpu.matmul %70, %72, %cst_68 {dimension_numbers = #tpu.dot_dimension_numbers<[1], [0], [0], [1], [0, 0, 1, 1], [], []>} : vector<16x8xbf16>, vector<8x512xbf16>, vector<16x512xf32> -> vector<16x512xf32>
    %74 = arith.addf %69, %73 : vector<16x512xf32>
    %cst_69 = arith.constant 0.000000e+00 : f32
    %75 = vector.broadcast %cst_69 : f32 to vector<16x512xf32>
    %76 = arith.maximumf %74, %75 : vector<16x512xf32>
    %c0_70 = arith.constant 0 : index
    %c0_71 = arith.constant 0 : index
    %c0_72 = arith.constant 0 : index
    %77 = vector.load %arg9[%c0_70, %c0_71, %c0_72] : memref<1x16x512xf32, #tpu.memory_space<vmem>>, vector<1x16x512xf32>
    %78 = vector.shape_cast %77 : vector<1x16x512xf32> to vector<16x512xf32>
    %79 = vector.shape_cast %76 : vector<16x512xf32> to vector<1x16x512xf32>
    tpu.vector_store %arg9[%c0_70, %c0_71, %c0_72], %79 {strides = array<i32>} : memref<1x16x512xf32, #tpu.memory_space<vmem>>, vector<1x16x512xf32>,
    return
  }
  func.func @transform_0(%arg0: i32, %arg1: i32) -> (i32, i32, i32, i32) {
    %c0_i32 = arith.constant 0 : i32
    %c0_i32_0 = arith.constant 0 : i32
    %c0_i32_1 = arith.constant 0 : i32
    return %arg0, %c0_i32, %c0_i32_0, %arg1 : i32, i32, i32, i32
  }
  func.func @transform_1(%arg0: i32, %arg1: i32) -> (i32, i32, i32) {
    %c0_i32 = arith.constant 0 : i32
    %c0_i32_0 = arith.constant 0 : i32
    return %arg0, %c0_i32, %arg1 : i32, i32, i32
  }
  func.func @transform_2(%arg0: i32, %arg1: i32) -> (i32, i32, i32) {
    %c0_i32 = arith.constant 0 : i32
    %c0_i32_0 = arith.constant 0 : i32
    return %arg0, %c0_i32, %arg1 : i32, i32, i32
  }
  func.func @transform_3(%arg0: i32, %arg1: i32) -> (i32, i32) {
    %c0_i32 = arith.constant 0 : i32
    %c0_i32_0 = arith.constant 0 : i32
    %c0_i32_1 = arith.constant 0 : i32
    return %c0_i32, %c0_i32_0 : i32, i32
  }
  func.func @transform_4(%arg0: i32, %arg1: i32) -> (i32, i32) {
    %c0_i32 = arith.constant 0 : i32
    %c0_i32_0 = arith.constant 0 : i32
    %c0_i32_1 = arith.constant 0 : i32
    return %c0_i32, %c0_i32_0 : i32, i32
  }
  func.func @transform_5(%arg0: i32, %arg1: i32) -> (i32, i32) {
    %c0_i32 = arith.constant 0 : i32
    %c0_i32_0 = arith.constant 0 : i32
    %c0_i32_1 = arith.constant 0 : i32
    return %c0_i32, %c0_i32_0 : i32, i32
  }
  func.func @transform_6(%arg0: i32, %arg1: i32) -> (i32, i32) {
    %c0_i32 = arith.constant 0 : i32
    %c0_i32_0 = arith.constant 0 : i32
    %c0_i32_1 = arith.constant 0 : i32
    return %c0_i32, %c0_i32_0 : i32, i32
  }
  func.func @transform_7(%arg0: i32, %arg1: i32) -> (i32, i32, i32) {
    %c0_i32 = arith.constant 0 : i32
    %c0_i32_0 = arith.constant 0 : i32
    return %arg0, %c0_i32, %arg1 : i32, i32, i32
  }
}

</mosaic_0001>

<bundles_post_ra>
// kernel: _lambda_.2
= control target key start
LH: loop header
LB: loop body
LE: loop exit
PB: predicated region body
PF: predicated region fallthrough
CT: control target
= control target key end

     0   :  { %s1931_s18 = smov 0   ;;  %s1933_s19 = smov 0   ;;  %s2260_s0 = inlined_call_operand.vmem [shape: bf16[2,8,8,1024], index: 0, kind: input, shape index: {}]   ;;  %s2261_s1 = inlined_call_operand.vmem [shape: bf16[2,8,1024], index: 1, kind: input, shape index: {}]   ;;  %s2262_s2 = inlined_call_operand.vmem [shape: bf16[16,8], index: 2, kind: input, shape index: {}]   ;;  %s2263_s3 = inlined_call_operand.vmem [shape: bf16[16,8], index: 3, kind: input, shape index: {}]   ;;  %s2264_s4 = inlined_call_operand.vmem [shape: f32[16,1], index: 4, kind: input, shape index: {}]   ;;  %s2265_s5 = inlined_call_operand.vmem [shape: bf16[2,16,1024], index: 5, kind: output, shape index: {}]  }
   0x1   :  { %s1935_s20 = smov 0   ;;  %s1937_s21 = smov 0  }
   0x2   :  { %s1939_s22 = smov 0   ;;  %s1941_s23 = smov 0  }
   0x3   :  { %s1943_s24 = smov 0  }
   0x4 LB: > { %s24_s25 = sadd.s32 1, %s1890_s22  ;;  %s27_s26 = sadd.s32 1, %s1894_s23  ;;  %s1898_s24 = sphi %s1943_s24, %s15_s24   ;;  %s1894_s23 = sphi %s1941_s23, %s2272_s23   ;;  %s1890_s22 = sphi %s1939_s22, %s2271_s22   ;;  %s1886_s21 = sphi %s1937_s21, %s2270_s21   ;;  %s1882_s20 = sphi %s1935_s20, %s2269_s20   ;;  %s1878_s19 = sphi %s1933_s19, %s2268_s19   ;;  %s1874_s18 = sphi %s1931_s18, %s2267_s18  }
   0x5   : > { %p25_p0 = scmp.ge.s32.totalorder %s24_s25, 2  ;;  %s1632_s27 = sadd.s32 4294967295, %s1898_s24  }
   0x6   : > { %p43_p1 = scmp.ne.s32.totalorder %s1878_s19, %s1874_s18  ;;  %p44_p2 = scmp.eq.s32.totalorder %s1898_s24, 0 }
   0x7   : > { %s2274_s25 = smov (%p25_p0, %s24_s25), 0  ;;  %s2276_s26 = smov (!%p25_p0, %s27_s26), %s1894_s23 }
   0x8   : > { %p29_p3 = scmp.ge.s32.totalorder %s2276_s26, 2  ;;  %p166_p4 = scmp.eq.s32.totalorder %s1632_s27, 3 }
   0x9   : > { %s32_s28 = ssub.s32 %s1890_s22, %s2274_s25  ;;  %p45_p5 = por %p44_p2, %p43_p1 }
   0xa   : > { %s2278_s26 = smov (%p29_p3, %s2276_s26), 0  ;;  %p1979_p6 = por %p166_p4, %p43_p1 }
   0xb   : > { %s31_s30 = ssub.s32 %s1894_s23, %s2278_s26  ;;  %s36_s7 = sadd.s32 1, %s1878_s19 }
   0xc   : > { %s33_s6 = sor.u32 %s32_s28, %s31_s30  ;;  %p1635_p8 = scmp.ge.s32.totalorder %s1898_s24, 4 }
   0xd   : > { %p34_p7 = scmp.eq.s32.totalorder %s33_s6, 0 }
   0xe   : > { %197 = sbr.rel (%p1635_p8) target bundleno = 36 (0x24), region = 28 }
   0xf   : > { %s1987_s8 = scalar_select %p34_p7, %s1878_s19, %s36_s7  }
  0x15   : > { %200 = sbr.rel (!%p45_p5) target bundleno = 36 (0x24), region = 32  ;;  %s202_s9 = sand.u32 (%p45_p5), 1, %s1878_s19  }
  0x16   : > { %s1637_s10 = sshll.u32 (%p45_p5), %s1890_s22, 2  ;;  %s1636_s11 = sshll.u32 (%p45_p5), %s202_s9, 7 }
  0x17   : > { %s1638_s12 = sshll.u32 (%p45_p5), %s1894_s23, 6  ;;  %s204_s27 = scalar_lea.vmem (%p45_p5), [#allocation2], %s1636_s11 }
  0x18   : > { %s207_s13 = sadd.s32 (%p45_p5), %s1638_s12, %s1637_s10 }
  0x19   : > { %s1639_s14 = sshll.u32 (%p45_p5), %s207_s13, 2 }
  0x1a   : > { %s1996_s17 = scalar_lea.vmem (%p45_p5), %s2260_s0, %s1639_s14 }
  0x1b   : > { %v222_v0 = vld [vmem:[%s1996_s17] sm:$0xff] (%p45_p5)  ;;  %v224_v1 = vld [vmem:[%s1996_s17 + $0x8] sm:$0xff] (%p45_p5) }
  0x1c   : > { %v226_v2 = vld [vmem:[%s1996_s17 + $0x20] sm:$0xff]  ;;  %223 = vst [vmem:[%s204_s27] sm:$0xff] %v222_v0  ;;  %225 = vst [vmem:[%s204_s27 + $0x8] sm:$0xff] %v224_v1  ;;  %v228_v3 = vld [vmem:[%s1996_s17 + $0x28] sm:$0xff] }
  0x1d   : > { %227 = vst [vmem:[%s204_s27 + $0x10] sm:$0xff] %v226_v2  ;;  %v230_v4 = vld [vmem:[%s1996_s17 + $0x40] sm:$0xff]  ;;  %v232_v5 = vld [vmem:[%s1996_s17 + $0x48] sm:$0xff]  ;;  %229 = vst [vmem:[%s204_s27 + $0x18] sm:$0xff] %v228_v3 }
  0x1e   : > { %231 = vst [vmem:[%s204_s27 + $0x20] sm:$0xff] %v230_v4  ;;  %233 = vst [vmem:[%s204_s27 + $0x28] sm:$0xff] %v232_v5  ;;  %v234_v6 = vld [vmem:[%s1996_s17 + $0x60] sm:$0xff]  ;;  %v236_v7 = vld [vmem:[%s1996_s17 + $0x68] sm:$0xff] }
  0x1f   : > { %v238_v8 = vld [vmem:[%s1996_s17 + $0x80] sm:$0xff]  ;;  %235 = vst [vmem:[%s204_s27 + $0x30] sm:$0xff] %v234_v6  ;;  %237 = vst [vmem:[%s204_s27 + $0x38] sm:$0xff] %v236_v7  ;;  %v240_v9 = vld [vmem:[%s1996_s17 + $0x88] sm:$0xff] }
  0x20   : > { %239 = vst [vmem:[%s204_s27 + $0x40] sm:$0xff] %v238_v8  ;;  %v242_v10 = vld [vmem:[%s1996_s17 + $0xa0] sm:$0xff]  ;;  %v244_v11 = vld [vmem:[%s1996_s17 + $0xa8] sm:$0xff]  ;;  %241 = vst [vmem:[%s204_s27 + $0x48] sm:$0xff] %v240_v9 }
  0x21   : > { %243 = vst [vmem:[%s204_s27 + $0x50] sm:$0xff] %v242_v10  ;;  %245 = vst [vmem:[%s204_s27 + $0x58] sm:$0xff] %v244_v11  ;;  %v246_v12 = vld [vmem:[%s1996_s17 + $0xc0] sm:$0xff]  ;;  %v248_v13 = vld [vmem:[%s1996_s17 + $0xc8] sm:$0xff] }
  0x22   : > { %v250_v14 = vld [vmem:[%s1996_s17 + $0xe0] sm:$0xff]  ;;  %247 = vst [vmem:[%s204_s27 + $0x60] sm:$0xff] %v246_v12  ;;  %249 = vst [vmem:[%s204_s27 + $0x68] sm:$0xff] %v248_v13  ;;  %v252_v15 = vld [vmem:[%s1996_s17 + $0xe8] sm:$0xff] }
  0x23   : > { %251 = vst [vmem:[%s204_s27 + $0x70] sm:$0xff] %v250_v14  ;;  %253 = vst [vmem:[%s204_s27 + $0x78] sm:$0xff] %v252_v15 }
  0x24 PF: > { %p1640_p9 = scmp.ge.s32.totalorder %s1898_s24, 1  ;;  %p271_p10 = scmp.lt.s32.totalorder %s1898_s24, 5 }
  0x26   : > { %p272_p11 = pnand %p1640_p9, %p271_p10 }
  0x27   : > { %s2017_s28 = sshll.u32 (!%p272_p11), %s1882_s20, 2  ;;  %p315_p12 = scmp.lt.s32.totalorder (!%p272_p11), %s1886_s21, 1  ;;  %v1900_v16 = vmov (!%p272_p11), 0   ;;  %v330_v17 = vld [vmem:[%s2264_s4] sm:$0xff] (!%p272_p11)  ;;  %v331_v18 = vld [vmem:[%s2264_s4 + $0x8] sm:$0xff] (!%p272_p11)  ;;  %vm361_vm0 = vcmask (!%p272_p11), 1043456  }
  0x28   : > { %275 = sbr.rel (%p272_p11) target bundleno = 356 (0x164), region = 59  ;;  %p317_p13 = scmp.lt.s32.totalorder (!%p272_p11), %s2017_s28, 7  ;;  %406 = vmatprep.mubr.bf16.mxu0 (!%p272_p11), %v1900_v16  ;;  %449 = vmatprep.mubr.bf16.mxu1 (!%p272_p11), %v1900_v16  ;;  %v1810_v33 = vld [vmem:[%s2263_s3] sm:$0xff] (!%p272_p11)   ;;  %vm357_vm1 = vcmask (!%p272_p11), 64512  }
  0x29   : > { %s278_s30 = sand.u32 (!%p272_p11), 1, %s1874_s18   ;;  %1805 = vset.pattern.permute.xlu0 (!%p272_p11), %v1900_v16  ;;  %v2064_v42 = vld [vmem:[%s2262_s2] sm:$0xff] (!%p272_p11)  }
  0x2a   : > { %s1641_s11 = sshll.u32 (!%p272_p11), %s278_s30, 7  ;;  %334 = vperm.xlu0 (!%p272_p11), %1805, %v330_v17  }
  0x2b   : > { %s2035_s16 = scalar_lea.vmem (!%p272_p11), [#allocation2], %s1641_s11  ;;  %s1642_s11 = sshll.u32 (!%p272_p11), %s278_s30, 5 }
  0x2c   : > { %v462_v19 = vld [vmem:[%s2035_s16] sm:$0xff] (!%p272_p11)  ;;  %v463_v20 = vld [vmem:[%s2035_s16 + $0x8] sm:$0xff] (!%p272_p11)  ;;  %v1664_v34 = vld [vmem:[%s2035_s16 + $0x10] sm:$0xff] (!%p272_p11)  ;;  %s312_s18 = scalar_lea.vmem (!%p272_p11), [#allocation3], %s1642_s11 }
  0x2d   : > { %v1657_v23 = vcombine.high (!%p272_p11), %v462_v19, %v462_v19  ;;  %v1659_v24 = vcombine.high (!%p272_p11), %v463_v20, %v463_v20  ;;  %v1656_v25 = vcombine.low (!%p272_p11), %v462_v19, %v462_v19  ;;  %v1658_v26 = vcombine.low (!%p272_p11), %v463_v20, %v463_v20  ;;  %v1665_v35 = vld [vmem:[%s2035_s16 + $0x18] sm:$0xff] (!%p272_p11)  ;;  %v1674_v43 = vld [vmem:[%s2035_s16 + $0x20] sm:$0xff] (!%p272_p11)  ;;  %v1675_v44 = vld [vmem:[%s2035_s16 + $0x28] sm:$0xff] (!%p272_p11) }
  0x2e   : > { %339 = vperm.xlu0 (!%p272_p11), %1805, %v331_v18   ;;  %v1667_v38 = vcombine.high (!%p272_p11), %v1664_v34, %v1664_v34  ;;  %v1669_v39 = vcombine.high (!%p272_p11), %v1665_v35, %v1665_v35  ;;  %v1666_v40 = vcombine.low (!%p272_p11), %v1664_v34, %v1664_v34  ;;  %v1668_v41 = vcombine.low (!%p272_p11), %v1665_v35, %v1665_v35  ;;  %v1684_v51 = vld [vmem:[%s2035_s16 + $0x30] sm:$0xff] (!%p272_p11)  ;;  %v1685_v52 = vld [vmem:[%s2035_s16 + $0x38] sm:$0xff] (!%p272_p11)  ;;  %v1694_v59 = vld [vmem:[%s2035_s16 + $0x40] sm:$0xff] (!%p272_p11) }
  0x2f   : > { %s316_s6 = scalar_select %p315_p12, %s1886_s21, 1  ;;  %v483_v36 = vsel %vm361_vm0, %v1656_v25, 0  ;;  %v489_v37 = vsel %vm361_vm0, %v1658_v26, 0  ;;  %v1677_v47 = vcombine.high %v1674_v43, %v1674_v43  ;;  %v1679_v48 = vcombine.high %v1675_v44, %v1675_v44  ;;  %v1695_v60 = vld [vmem:[%s2035_s16 + $0x48] sm:$0xff]  ;;  %v1704_v3 = vld [vmem:[%s2035_s16 + $0x50] sm:$0xff]  ;;  %v1705_v4 = vld [vmem:[%s2035_s16 + $0x58] sm:$0xff] }
  0x30   : > { %s318_s7 = scalar_select %p317_p13, %s2017_s28, 7  ;;  %v602_v45 = vsel %vm361_vm0, %v1666_v40, 0  ;;  %v608_v46 = vsel %vm361_vm0, %v1668_v41, 0  ;;  %v1676_v49 = vcombine.low %v1674_v43, %v1674_v43  ;;  %v1678_v50 = vcombine.low %v1675_v44, %v1675_v44  ;;  %v1714_v11 = vld [vmem:[%s2035_s16 + $0x60] sm:$0xff]  ;;  %v1715_v12 = vld [vmem:[%s2035_s16 + $0x68] sm:$0xff]  ;;  %v1724_v20 = vld [vmem:[%s2035_s16 + $0x70] sm:$0xff] }
  0x31   : > { %s1644_s20 = sshll.u32 %s316_s6, 3  ;;  %v1687_v55 = vcombine.high %v1684_v51, %v1684_v51  ;;  %v1689_v56 = vcombine.high %v1685_v52, %v1685_v52  ;;  %v1686_v57 = vcombine.low %v1684_v51, %v1684_v51  ;;  %v1688_v58 = vcombine.low %v1685_v52, %v1685_v52  ;;  %s1740_s30 = sshll.u32 (%p1979_p6), %s1886_s21, 4 }
  0x32   : > { %s320_s12 = sadd.s32 %s1644_s20, %s318_s7  ;;  %v729_v53 = vsel %vm361_vm0, %v1676_v49, 0  ;;  %v735_v54 = vsel %vm361_vm0, %v1678_v50, 0  ;;  %v1697_v63 = vcombine.high %v1694_v59, %v1694_v59  ;;  %v1699_v0 = vcombine.high %v1695_v60, %v1695_v60 }
  0x33   : > { %s1645_s15 = sshll.u32 %s320_s12, 2  ;;  %v856_v61 = vsel %vm361_vm0, %v1686_v57, 0  ;;  %v862_v62 = vsel %vm361_vm0, %v1688_v58, 0  ;;  %v1696_v1 = vcombine.low %v1694_v59, %v1694_v59  ;;  %v1698_v2 = vcombine.low %v1695_v60, %v1695_v60  ;;  %s1514_s12 = sadd.s32 (%p1979_p6), %s1740_s30, %s2017_s28 }
  0x34   : > { %s322_s9 = scalar_lea.vmem %s2261_s1, %s1645_s15  ;;  %v1707_v7 = vcombine.high %v1704_v3, %v1704_v3  ;;  %v1709_v8 = vcombine.high %v1705_v4, %v1705_v4  ;;  %v1706_v9 = vcombine.low %v1704_v3, %v1704_v3  ;;  %v1708_v10 = vcombine.low %v1705_v4, %v1705_v4  ;;  %s1741_s13 = sshll.u32 (%p1979_p6), %s1514_s12, 2 }
  0x35   : > { %v328_v21 = vld [vmem:[%s322_s9] sm:$0xff]  ;;  %v329_v22 = vld [vmem:[%s322_s9 + $0x8] sm:$0xff]  ;;  %v983_v5 = vsel %vm361_vm0, %v1696_v1, 0  ;;  %v989_v6 = vsel %vm361_vm0, %v1698_v2, 0  ;;  %v1717_v15 = vcombine.high %v1714_v11, %v1714_v11  ;;  %v1719_v17 = vcombine.high %v1715_v12, %v1715_v12 }
  0x36   : > { %v1648_v27 = vcombine.high %v328_v21, %v328_v21  ;;  %v1650_v28 = vcombine.high %v329_v22, %v329_v22  ;;  %v1647_v29 = vcombine.low %v328_v21, %v328_v21  ;;  %v1649_v30 = vcombine.low %v329_v22, %v329_v22  ;;  %v1725_v21 = vld [vmem:[%s2035_s16 + $0x78] sm:$0xff]  ;;  %s1516_s16 = scalar_lea.vmem (%p1979_p6), %s2265_s5, %s1741_s13 }
  0x37   : > { %v1110_v13 = vsel %vm361_vm0, %v1706_v9, 0  ;;  %v1116_v14 = vsel %vm361_vm0, %v1708_v10, 0  ;;  %v1716_v18 = vcombine.low %v1714_v11, %v1714_v11  ;;  %v1718_v19 = vcombine.low %v1715_v12, %v1715_v12 }
  0x38   : > { %1651 = vmatprep.subr.msk.bf16.mxu0 %vm361_vm0, %v1648_v27  ;;  %1653 = vmatprep.subr.msk.bf16.mxu1 %vm361_vm0, %v1650_v28  ;;  %v363_v31 = vsel %vm361_vm0, %v1647_v29, 0  ;;  %v369_v32 = vsel %vm361_vm0, %v1649_v30, 0  ;;  %v1729_v25 = vcombine.high %v1725_v21, %v1725_v21  ;;  %v1726_v26 = vcombine.low %v1724_v20, %v1724_v20 }
  0x39   : > { %375 = vmatpush1.bf16.msra.mxu0 %v363_v31  ;;  %418 = vmatpush1.bf16.msra.mxu1 %v369_v32  ;;  %v1237_v22 = vsel %vm361_vm0, %v1716_v18, 0  ;;  %v1728_v27 = vcombine.low %v1725_v21, %v1725_v21 }
  0x3a   : > { %1660 = vmatprep.subr.msk.bf16.mxu0 %vm361_vm0, %v1657_v23  ;;  %1662 = vmatprep.subr.msk.bf16.mxu1 %vm361_vm0, %v1659_v24  ;;  %v1243_v23 = vsel %vm361_vm0, %v1718_v19, 0  ;;  %v1727_v24 = vcombine.high %v1724_v20, %v1724_v20  ;;  %v1364_v28 = vsel %vm361_vm0, %v1726_v26, 0 }
  0x3b   : > { %v1370_v29 = vsel %vm361_vm0, %v1728_v27, 0 }
  0x3c   : > { %1652 = vmatmul.mubr.msk.bf16.vlgmr.msra.gmra.mrb[0].mxu0 %vm357_vm1, %v1810_v33  ;;  %1654 = vmatmul.mubr.msk.bf16.vlgmr.msra.gmra.mrb[0].mxu1 %vm357_vm1, %v1810_v33 }
  0x3d   : > { %495 = vmatpush1.bf16.msra.mxu0 %v483_v36  ;;  %538 = vmatpush1.bf16.msra.mxu1 %v489_v37 }
  0x3e   : > { %526 = vmatprep.mubr.bf16.mxu0 %v1900_v16  ;;  %569 = vmatprep.mubr.bf16.mxu1 %v1900_v16 }
  0x3f   : > { %1670 = vmatprep.subr.msk.bf16.mxu0 %vm361_vm0, %v1667_v38  ;;  %1672 = vmatprep.subr.msk.bf16.mxu1 %vm361_vm0, %v1669_v39 }
  0x44   : > { %1661 = vmatmul.mubr.msk.bf16.vlgmr.msra.gmra.mrb[4].mxu0 %vm357_vm1, %v2064_v42  ;;  %1663 = vmatmul.mubr.msk.bf16.vlgmr.msra.gmra.mrb[4].mxu1 %vm357_vm1, %v2064_v42 }
  0x45   : > { %614 = vmatpush1.bf16.msra.mxu0 %v602_v45  ;;  %657 = vmatpush1.bf16.msra.mxu1 %v608_v46 }
  0x46   : > { %645 = vmatprep.mubr.bf16.mxu0 %v1900_v16  ;;  %688 = vmatprep.mubr.bf16.mxu1 %v1900_v16 }
  0x47   : > { %1680 = vmatprep.subr.msk.bf16.mxu0 %vm361_vm0, %v1677_v47  ;;  %1682 = vmatprep.subr.msk.bf16.mxu1 %vm361_vm0, %v1679_v48 }
  0x4c   : > { %1671 = vmatmul.mubr.msk.bf16.vlgmr.msra.gmra.mrb[8].mxu0 %vm357_vm1, %v2064_v42  ;;  %1673 = vmatmul.mubr.msk.bf16.vlgmr.msra.gmra.mrb[8].mxu1 %vm357_vm1, %v2064_v42 }
  0x4d   : > { %741 = vmatpush1.bf16.msra.mxu0 %v729_v53  ;;  %784 = vmatpush1.bf16.msra.mxu1 %v735_v54 }
  0x4e   : > { %772 = vmatprep.mubr.bf16.mxu0 %v1900_v16  ;;  %815 = vmatprep.mubr.bf16.mxu1 %v1900_v16 }
  0x4f   : > { %1690 = vmatprep.subr.msk.bf16.mxu0 %vm361_vm0, %v1687_v55  ;;  %1692 = vmatprep.subr.msk.bf16.mxu1 %vm361_vm0, %v1689_v56 }
  0x54   : > { %1681 = vmatmul.mubr.msk.bf16.vlgmr.msra.gmra.mrb[12].mxu0 %vm357_vm1, %v2064_v42  ;;  %1683 = vmatmul.mubr.msk.bf16.vlgmr.msra.gmra.mrb[12].mxu1 %vm357_vm1, %v2064_v42 }
  0x55   : > { %868 = vmatpush1.bf16.msra.mxu0 %v856_v61  ;;  %911 = vmatpush1.bf16.msra.mxu1 %v862_v62 }
  0x56   : > { %899 = vmatprep.mubr.bf16.mxu0 %v1900_v16  ;;  %942 = vmatprep.mubr.bf16.mxu1 %v1900_v16 }
  0x57   : > { %1700 = vmatprep.subr.msk.bf16.mxu0 %vm361_vm0, %v1697_v63  ;;  %1702 = vmatprep.subr.msk.bf16.mxu1 %vm361_vm0, %v1699_v0 }
  0x5c   : > { %1691 = vmatmul.mubr.msk.bf16.vlgmr.msra.gmra.mrb[16].mxu0 %vm357_vm1, %v2064_v42  ;;  %1693 = vmatmul.mubr.msk.bf16.vlgmr.msra.gmra.mrb[16].mxu1 %vm357_vm1, %v2064_v42 }
  0x5d   : > { %995 = vmatpush1.bf16.msra.mxu0 %v983_v5  ;;  %1038 = vmatpush1.bf16.msra.mxu1 %v989_v6 }
  0x5e   : > { %1026 = vmatprep.mubr.bf16.mxu0 %v1900_v16  ;;  %1069 = vmatprep.mubr.bf16.mxu1 %v1900_v16 }
  0x5f   : > { %1710 = vmatprep.subr.msk.bf16.mxu0 %vm361_vm0, %v1707_v7  ;;  %1712 = vmatprep.subr.msk.bf16.mxu1 %vm361_vm0, %v1709_v8 }
  0x64   : > { %1701 = vmatmul.mubr.msk.bf16.vlgmr.msra.gmra.mrb[20].mxu0 %vm357_vm1, %v2064_v42  ;;  %1703 = vmatmul.mubr.msk.bf16.vlgmr.msra.gmra.mrb[20].mxu1 %vm357_vm1, %v2064_v42 }
  0x65   : > { %1122 = vmatpush1.bf16.msra.mxu0 %v1110_v13  ;;  %1165 = vmatpush1.bf16.msra.mxu1 %v1116_v14 }
  0x66   : > { %1153 = vmatprep.mubr.bf16.mxu0 %v1900_v16  ;;  %1196 = vmatprep.mubr.bf16.mxu1 %v1900_v16 }
  0x67   : > { %1720 = vmatprep.subr.msk.bf16.mxu0 %vm361_vm0, %v1717_v15  ;;  %1722 = vmatprep.subr.msk.bf16.mxu1 %vm361_vm0, %v1719_v17 }
  0x6c   : > { %1711 = vmatmul.mubr.msk.bf16.vlgmr.msra.gmra.mrb[24].mxu0 %vm357_vm1, %v2064_v42  ;;  %1713 = vmatmul.mubr.msk.bf16.vlgmr.msra.gmra.mrb[24].mxu1 %vm357_vm1, %v2064_v42 }
  0x6d   : > { %1249 = vmatpush1.bf16.msra.mxu0 %v1237_v22  ;;  %1292 = vmatpush1.bf16.msra.mxu1 %v1243_v23 }
  0x6e   : > { %1280 = vmatprep.mubr.bf16.mxu0 %v1900_v16  ;;  %1323 = vmatprep.mubr.bf16.mxu1 %v1900_v16 }
  0x6f   : > { %1730 = vmatprep.subr.msk.bf16.mxu0 %vm361_vm0, %v1727_v24  ;;  %1732 = vmatprep.subr.msk.bf16.mxu1 %vm361_vm0, %v1729_v25 }
  0x74   : > { %1721 = vmatmul.mubr.msk.bf16.vlgmr.msra.gmra.mrb[28].mxu0 %vm357_vm1, %v2064_v42  ;;  %1723 = vmatmul.mubr.msk.bf16.vlgmr.msra.gmra.mrb[28].mxu1 %vm357_vm1, %v2064_v42 }
  0x75   : > { %1376 = vmatpush1.bf16.msra.mxu0 %v1364_v28  ;;  %1419 = vmatpush1.bf16.msra.mxu1 %v1370_v29 }
  0x76   : > { %1407 = vmatprep.mubr.bf16.mxu0 %v1900_v16  ;;  %1450 = vmatprep.mubr.bf16.mxu1 %v1900_v16 }
  0x7c   : > { %1731 = vmatmul.mubr.msk.bf16.vlgmr.msra.gmra.mrb[32].mxu0 %vm357_vm1, %v2064_v42  ;;  %1733 = vmatmul.mubr.msk.bf16.vlgmr.msra.gmra.mrb[32].mxu1 %vm357_vm1, %v2064_v42 }
  0xa9   : > { %v335_v30 = vpop.permute.xlu0 %334 }
  0xad   : > { %v340_v39 = vpop.permute.xlu0 %339 }
 0x10f   : > { %v408_v31 = vpop.f32.mrb[0].mxu0  ;;  %v451_v32 = vpop.f32.mrb[0].mxu1 }
 0x110   : > { %v410_v33 = vpop.f32.mrb[1].mxu0  ;;  %v453_v34 = vpop.f32.mrb[1].mxu1  ;;  %v2150_v40 = vadd.f32 %v408_v31, %v335_v30  ;;  %v2152_v41 = vadd.f32 %v451_v32, %v335_v30 }
 0x111   : > { %v412_v35 = vpop.f32.mrb[2].mxu0  ;;  %v455_v36 = vpop.f32.mrb[2].mxu1  ;;  %v2154_v16 = vadd.f32 %v410_v33, %v335_v30  ;;  %v2156_v43 = vadd.f32 %v453_v34, %v335_v30 }
 0x112   : > { %v414_v37 = vpop.f32.mrb[3].mxu0  ;;  %v457_v38 = vpop.f32.mrb[3].mxu1  ;;  %v2158_v45 = vadd.f32 %v412_v35, %v340_v39  ;;  %v2160_v46 = vadd.f32 %v455_v36, %v340_v39 }
 0x113   : > { %v2164_v51 = vadd.f32 %v414_v37, %v340_v39  ;;  %v2166_v52 = vadd.f32 %v457_v38, %v340_v39 }
 0x117   : > { %v528_v44 = vpop.f32.mrb[4].mxu0  ;;  %v571_v42 = vpop.f32.mrb[4].mxu1 }
 0x118   : > { %v529_v47 = vadd.f32 %v528_v44, %v2150_v40  ;;  %v572_v48 = vadd.f32 %v571_v42, %v2152_v41  ;;  %v530_v49 = vpop.f32.mrb[5].mxu0  ;;  %v573_v50 = vpop.f32.mrb[5].mxu1 }
 0x119   : > { %v531_v53 = vadd.f32 %v530_v49, %v2154_v16  ;;  %v574_v54 = vadd.f32 %v573_v50, %v2156_v43  ;;  %v532_v55 = vpop.f32.mrb[6].mxu0  ;;  %v575_v56 = vpop.f32.mrb[6].mxu1 }
 0x11a   : > { %v533_v57 = vadd.f32 %v532_v55, %v2158_v45  ;;  %v576_v58 = vadd.f32 %v575_v56, %v2160_v46  ;;  %v534_v59 = vpop.f32.mrb[7].mxu0  ;;  %v577_v60 = vpop.f32.mrb[7].mxu1  ;;  %v580_v63 = vmax.f32 %v529_v47, 0.0  ;;  %v582_v0 = vmax.f32 %v572_v48, 0.0 }
 0x11b   : > { %v535_v61 = vadd.f32 %v534_v59, %v2164_v51  ;;  %v578_v62 = vadd.f32 %v577_v60, %v2166_v52  ;;  %v581_v1 = vmax.f32 %v531_v53, 0.0  ;;  %v583_v2 = vmax.f32 %v574_v54, 0.0 }
 0x11c   : > { %v584_v5 = vmax.f32 %v533_v57, 0.0  ;;  %v586_v6 = vmax.f32 %v576_v58, 0.0 }
 0x11d   : > { %v585_v11 = vmax.f32 %v535_v61, 0.0  ;;  %v587_v12 = vmax.f32 %v578_v62, 0.0 }
 0x11f   : > { %v647_v3 = vpop.f32.mrb[8].mxu0  ;;  %v690_v4 = vpop.f32.mrb[8].mxu1 }
 0x120   : > { %v648_v7 = vadd.f32 %v647_v3, %v2150_v40  ;;  %v691_v8 = vadd.f32 %v690_v4, %v2152_v41  ;;  %v649_v9 = vpop.f32.mrb[9].mxu0  ;;  %v692_v10 = vpop.f32.mrb[9].mxu1 }
 0x121   : > { %v650_v13 = vadd.f32 %v649_v9, %v2154_v16  ;;  %v693_v14 = vadd.f32 %v692_v10, %v2156_v43  ;;  %v651_v15 = vpop.f32.mrb[10].mxu0  ;;  %v694_v17 = vpop.f32.mrb[10].mxu1 }
 0x122   : > { %v699_v18 = vmax.f32 %v648_v7, 0.0  ;;  %v701_v19 = vmax.f32 %v691_v8, 0.0  ;;  %v652_v20 = vadd.f32 %v651_v15, %v2158_v45  ;;  %v695_v21 = vadd.f32 %v694_v17, %v2160_v46  ;;  %v653_v22 = vpop.f32.mrb[11].mxu0  ;;  %v696_v23 = vpop.f32.mrb[11].mxu1 }
 0x123   : > { %v700_v24 = vmax.f32 %v650_v13, 0.0  ;;  %v702_v25 = vmax.f32 %v693_v14, 0.0  ;;  %v654_v26 = vadd.f32 %v653_v22, %v2164_v51  ;;  %v697_v27 = vadd.f32 %v696_v23, %v2166_v52 }
 0x124   : > { %v707_v28 = vmax.f32 %v580_v63, %v699_v18  ;;  %v709_v29 = vmax.f32 %v582_v0, %v701_v19  ;;  %v703_v30 = vmax.f32 %v652_v20, 0.0  ;;  %v705_v31 = vmax.f32 %v695_v21, 0.0 }
 0x125   : > { %v708_v32 = vmax.f32 %v581_v1, %v700_v24  ;;  %v710_v33 = vmax.f32 %v583_v2, %v702_v25  ;;  %v704_v34 = vmax.f32 %v654_v26, 0.0  ;;  %v706_v35 = vmax.f32 %v697_v27, 0.0 }
 0x126   : > { %v711_v36 = vmax.f32 %v584_v5, %v703_v30  ;;  %v713_v37 = vmax.f32 %v586_v6, %v705_v31 }
 0x127   : > { %v712_v38 = vmax.f32 %v585_v11, %v704_v34  ;;  %v714_v39 = vmax.f32 %v587_v12, %v706_v35  ;;  %v774_v44 = vpop.f32.mrb[12].mxu0  ;;  %v817_v42 = vpop.f32.mrb[12].mxu1 }
 0x128   : > { %v775_v47 = vadd.f32 %v774_v44, %v2150_v40  ;;  %v818_v48 = vadd.f32 %v817_v42, %v2152_v41  ;;  %v776_v49 = vpop.f32.mrb[13].mxu0  ;;  %v819_v50 = vpop.f32.mrb[13].mxu1 }
 0x129   : > { %v777_v53 = vadd.f32 %v776_v49, %v2154_v16  ;;  %v820_v54 = vadd.f32 %v819_v50, %v2156_v43  ;;  %v778_v55 = vpop.f32.mrb[14].mxu0  ;;  %v821_v56 = vpop.f32.mrb[14].mxu1 }
 0x12a   : > { %v826_v57 = vmax.f32 %v775_v47, 0.0  ;;  %v828_v58 = vmax.f32 %v818_v48, 0.0  ;;  %v779_v59 = vadd.f32 %v778_v55, %v2158_v45  ;;  %v822_v60 = vadd.f32 %v821_v56, %v2160_v46  ;;  %v780_v61 = vpop.f32.mrb[15].mxu0  ;;  %v823_v62 = vpop.f32.mrb[15].mxu1 }
 0x12b   : > { %v827_v63 = vmax.f32 %v777_v53, 0.0  ;;  %v829_v0 = vmax.f32 %v820_v54, 0.0  ;;  %v781_v1 = vadd.f32 %v780_v61, %v2164_v51  ;;  %v824_v2 = vadd.f32 %v823_v62, %v2166_v52 }
 0x12c   : > { %v834_v3 = vmax.f32 %v707_v28, %v826_v57  ;;  %v836_v4 = vmax.f32 %v709_v29, %v828_v58  ;;  %v830_v5 = vmax.f32 %v779_v59, 0.0  ;;  %v832_v6 = vmax.f32 %v822_v60, 0.0 }
 0x12d   : > { %v835_v7 = vmax.f32 %v708_v32, %v827_v63  ;;  %v837_v8 = vmax.f32 %v710_v33, %v829_v0  ;;  %v831_v9 = vmax.f32 %v781_v1, 0.0  ;;  %v833_v10 = vmax.f32 %v824_v2, 0.0 }
 0x12e   : > { %v838_v11 = vmax.f32 %v711_v36, %v830_v5  ;;  %v840_v12 = vmax.f32 %v713_v37, %v832_v6 }
 0x12f   : > { %v839_v13 = vmax.f32 %v712_v38, %v831_v9  ;;  %v841_v14 = vmax.f32 %v714_v39, %v833_v10  ;;  %v901_v15 = vpop.f32.mrb[16].mxu0  ;;  %v944_v17 = vpop.f32.mrb[16].mxu1 }
 0x130   : > { %v902_v18 = vadd.f32 %v901_v15, %v2150_v40  ;;  %v945_v19 = vadd.f32 %v944_v17, %v2152_v41  ;;  %v903_v20 = vpop.f32.mrb[17].mxu0  ;;  %v946_v21 = vpop.f32.mrb[17].mxu1 }
 0x131   : > { %v904_v22 = vadd.f32 %v903_v20, %v2154_v16  ;;  %v947_v23 = vadd.f32 %v946_v21, %v2156_v43  ;;  %v905_v24 = vpop.f32.mrb[18].mxu0  ;;  %v948_v25 = vpop.f32.mrb[18].mxu1 }
 0x132   : > { %v953_v26 = vmax.f32 %v902_v18, 0.0  ;;  %v955_v27 = vmax.f32 %v945_v19, 0.0  ;;  %v906_v28 = vadd.f32 %v905_v24, %v2158_v45  ;;  %v949_v29 = vadd.f32 %v948_v25, %v2160_v46  ;;  %v907_v30 = vpop.f32.mrb[19].mxu0  ;;  %v950_v31 = vpop.f32.mrb[19].mxu1 }
 0x133   : > { %v954_v32 = vmax.f32 %v904_v22, 0.0  ;;  %v956_v33 = vmax.f32 %v947_v23, 0.0  ;;  %v908_v34 = vadd.f32 %v907_v30, %v2164_v51  ;;  %v951_v35 = vadd.f32 %v950_v31, %v2166_v52 }
 0x134   : > { %v961_v36 = vmax.f32 %v834_v3, %v953_v26  ;;  %v963_v37 = vmax.f32 %v836_v4, %v955_v27  ;;  %v957_v38 = vmax.f32 %v906_v28, 0.0  ;;  %v959_v39 = vmax.f32 %v949_v29, 0.0 }
 0x135   : > { %v962_v44 = vmax.f32 %v835_v7, %v954_v32  ;;  %v964_v42 = vmax.f32 %v837_v8, %v956_v33  ;;  %v958_v47 = vmax.f32 %v908_v34, 0.0  ;;  %v960_v48 = vmax.f32 %v951_v35, 0.0 }
 0x136   : > { %v965_v49 = vmax.f32 %v838_v11, %v957_v38  ;;  %v967_v50 = vmax.f32 %v840_v12, %v959_v39 }
 0x137   : > { %v966_v53 = vmax.f32 %v839_v13, %v958_v47  ;;  %v968_v54 = vmax.f32 %v841_v14, %v960_v48  ;;  %v1028_v55 = vpop.f32.mrb[20].mxu0  ;;  %v1071_v56 = vpop.f32.mrb[20].mxu1 }
 0x138   : > { %v1029_v57 = vadd.f32 %v1028_v55, %v2150_v40  ;;  %v1072_v58 = vadd.f32 %v1071_v56, %v2152_v41  ;;  %v1030_v59 = vpop.f32.mrb[21].mxu0  ;;  %v1073_v60 = vpop.f32.mrb[21].mxu1 }
 0x139   : > { %v1031_v61 = vadd.f32 %v1030_v59, %v2154_v16  ;;  %v1074_v62 = vadd.f32 %v1073_v60, %v2156_v43  ;;  %v1032_v63 = vpop.f32.mrb[22].mxu0  ;;  %v1075_v0 = vpop.f32.mrb[22].mxu1 }
 0x13a   : > { %v1080_v1 = vmax.f32 %v1029_v57, 0.0  ;;  %v1082_v2 = vmax.f32 %v1072_v58, 0.0  ;;  %v1033_v3 = vadd.f32 %v1032_v63, %v2158_v45  ;;  %v1076_v4 = vadd.f32 %v1075_v0, %v2160_v46  ;;  %v1034_v5 = vpop.f32.mrb[23].mxu0  ;;  %v1077_v6 = vpop.f32.mrb[23].mxu1 }
 0x13b   : > { %v1081_v7 = vmax.f32 %v1031_v61, 0.0  ;;  %v1083_v8 = vmax.f32 %v1074_v62, 0.0  ;;  %v1035_v9 = vadd.f32 %v1034_v5, %v2164_v51  ;;  %v1078_v10 = vadd.f32 %v1077_v6, %v2166_v52 }
 0x13c   : > { %v1088_v11 = vmax.f32 %v961_v36, %v1080_v1  ;;  %v1090_v12 = vmax.f32 %v963_v37, %v1082_v2  ;;  %v1084_v13 = vmax.f32 %v1033_v3, 0.0  ;;  %v1086_v14 = vmax.f32 %v1076_v4, 0.0 }
 0x13d   : > { %v1089_v15 = vmax.f32 %v962_v44, %v1081_v7  ;;  %v1091_v17 = vmax.f32 %v964_v42, %v1083_v8  ;;  %v1085_v18 = vmax.f32 %v1035_v9, 0.0  ;;  %v1087_v19 = vmax.f32 %v1078_v10, 0.0 }
 0x13e   : > { %v1092_v20 = vmax.f32 %v965_v49, %v1084_v13  ;;  %v1094_v21 = vmax.f32 %v967_v50, %v1086_v14 }
 0x13f   : > { %v1093_v22 = vmax.f32 %v966_v53, %v1085_v18  ;;  %v1095_v23 = vmax.f32 %v968_v54, %v1087_v19  ;;  %v1155_v24 = vpop.f32.mrb[24].mxu0  ;;  %v1198_v25 = vpop.f32.mrb[24].mxu1 }
 0x140   : > { %v1156_v26 = vadd.f32 %v1155_v24, %v2150_v40  ;;  %v1199_v27 = vadd.f32 %v1198_v25, %v2152_v41  ;;  %v1157_v28 = vpop.f32.mrb[25].mxu0  ;;  %v1200_v29 = vpop.f32.mrb[25].mxu1 }
 0x141   : > { %v1158_v30 = vadd.f32 %v1157_v28, %v2154_v16  ;;  %v1201_v31 = vadd.f32 %v1200_v29, %v2156_v43  ;;  %v1159_v32 = vpop.f32.mrb[26].mxu0  ;;  %v1202_v33 = vpop.f32.mrb[26].mxu1 }
 0x142   : > { %v1207_v34 = vmax.f32 %v1156_v26, 0.0  ;;  %v1209_v35 = vmax.f32 %v1199_v27, 0.0  ;;  %v1160_v36 = vadd.f32 %v1159_v32, %v2158_v45  ;;  %v1203_v37 = vadd.f32 %v1202_v33, %v2160_v46  ;;  %v1161_v38 = vpop.f32.mrb[27].mxu0  ;;  %v1204_v39 = vpop.f32.mrb[27].mxu1 }
 0x143   : > { %v1208_v44 = vmax.f32 %v1158_v30, 0.0  ;;  %v1210_v42 = vmax.f32 %v1201_v31, 0.0  ;;  %v1162_v47 = vadd.f32 %v1161_v38, %v2164_v51  ;;  %v1205_v48 = vadd.f32 %v1204_v39, %v2166_v52 }
 0x144   : > { %v1215_v49 = vmax.f32 %v1088_v11, %v1207_v34  ;;  %v1217_v50 = vmax.f32 %v1090_v12, %v1209_v35  ;;  %v1211_v53 = vmax.f32 %v1160_v36, 0.0  ;;  %v1213_v54 = vmax.f32 %v1203_v37, 0.0 }
 0x145   : > { %v1216_v55 = vmax.f32 %v1089_v15, %v1208_v44  ;;  %v1218_v56 = vmax.f32 %v1091_v17, %v1210_v42  ;;  %v1212_v57 = vmax.f32 %v1162_v47, 0.0  ;;  %v1214_v58 = vmax.f32 %v1205_v48, 0.0 }
 0x146   : > { %v1219_v59 = vmax.f32 %v1092_v20, %v1211_v53  ;;  %v1221_v60 = vmax.f32 %v1094_v21, %v1213_v54 }
 0x147   : > { %v1220_v61 = vmax.f32 %v1093_v22, %v1212_v57  ;;  %v1222_v62 = vmax.f32 %v1095_v23, %v1214_v58  ;;  %v1282_v63 = vpop.f32.mrb[28].mxu0  ;;  %v1325_v0 = vpop.f32.mrb[28].mxu1 }
 0x148   : > { %v1283_v1 = vadd.f32 %v1282_v63, %v2150_v40  ;;  %v1326_v2 = vadd.f32 %v1325_v0, %v2152_v41  ;;  %v1284_v3 = vpop.f32.mrb[29].mxu0  ;;  %v1327_v4 = vpop.f32.mrb[29].mxu1 }
 0x149   : > { %v1285_v5 = vadd.f32 %v1284_v3, %v2154_v16  ;;  %v1328_v6 = vadd.f32 %v1327_v4, %v2156_v43  ;;  %v1286_v7 = vpop.f32.mrb[30].mxu0  ;;  %v1329_v8 = vpop.f32.mrb[30].mxu1 }
 0x14a   : > { %v1334_v9 = vmax.f32 %v1283_v1, 0.0  ;;  %v1336_v10 = vmax.f32 %v1326_v2, 0.0  ;;  %v1287_v11 = vadd.f32 %v1286_v7, %v2158_v45  ;;  %v1330_v12 = vadd.f32 %v1329_v8, %v2160_v46  ;;  %v1288_v13 = vpop.f32.mrb[31].mxu0  ;;  %v1331_v14 = vpop.f32.mrb[31].mxu1 }
 0x14b   : > { %v1335_v15 = vmax.f32 %v1285_v5, 0.0  ;;  %v1337_v17 = vmax.f32 %v1328_v6, 0.0  ;;  %v1289_v18 = vadd.f32 %v1288_v13, %v2164_v51  ;;  %v1332_v19 = vadd.f32 %v1331_v14, %v2166_v52 }
 0x14c   : > { %v1342_v20 = vmax.f32 %v1215_v49, %v1334_v9  ;;  %v1344_v21 = vmax.f32 %v1217_v50, %v1336_v10  ;;  %v1338_v22 = vmax.f32 %v1287_v11, 0.0  ;;  %v1340_v23 = vmax.f32 %v1330_v12, 0.0 }
 0x14d   : > { %v1343_v24 = vmax.f32 %v1216_v55, %v1335_v15  ;;  %v1345_v25 = vmax.f32 %v1218_v56, %v1337_v17  ;;  %v1339_v26 = vmax.f32 %v1289_v18, 0.0  ;;  %v1341_v27 = vmax.f32 %v1332_v19, 0.0 }
 0x14e   : > { %v1346_v28 = vmax.f32 %v1219_v59, %v1338_v22  ;;  %v1348_v29 = vmax.f32 %v1221_v60, %v1340_v23 }
 0x14f   : > { %v1347_v30 = vmax.f32 %v1220_v61, %v1339_v26  ;;  %v1349_v31 = vmax.f32 %v1222_v62, %v1341_v27  ;;  %v1409_v32 = vpop.f32.mrb[32].mxu0  ;;  %v1452_v33 = vpop.f32.mrb[32].mxu1 }
 0x150   : > { %v1410_v34 = vadd.f32 %v1409_v32, %v2150_v40  ;;  %v1453_v35 = vadd.f32 %v1452_v33, %v2152_v41  ;;  %v1411_v36 = vpop.f32.mrb[33].mxu0  ;;  %v1454_v37 = vpop.f32.mrb[33].mxu1 }
 0x151   : > { %v1412_v38 = vadd.f32 %v1411_v36, %v2154_v16  ;;  %v1455_v39 = vadd.f32 %v1454_v37, %v2156_v43  ;;  %v1413_v44 = vpop.f32.mrb[34].mxu0  ;;  %v1456_v42 = vpop.f32.mrb[34].mxu1 }
 0x152   : > { %v1461_v47 = vmax.f32 %v1410_v34, 0.0  ;;  %v1463_v48 = vmax.f32 %v1453_v35, 0.0  ;;  %v1414_v49 = vadd.f32 %v1413_v44, %v2158_v45  ;;  %v1457_v50 = vadd.f32 %v1456_v42, %v2160_v46  ;;  %v1415_v53 = vpop.f32.mrb[35].mxu0  ;;  %v1458_v54 = vpop.f32.mrb[35].mxu1 }
 0x153   : > { %v1462_v40 = vmax.f32 %v1412_v38, 0.0  ;;  %v1464_v41 = vmax.f32 %v1455_v39, 0.0  ;;  %v1416_v55 = vadd.f32 %v1415_v53, %v2164_v51  ;;  %v1459_v16 = vadd.f32 %v1458_v54, %v2166_v52 }
 0x154   : > { %v1469_v56 = vmax.f32 %v1342_v20, %v1461_v47  ;;  %v1471_v43 = vmax.f32 %v1344_v21, %v1463_v48  ;;  %v1465_v57 = vmax.f32 %v1414_v49, 0.0  ;;  %v1467_v58 = vmax.f32 %v1457_v50, 0.0 }
 0x155   : > { %v1470_v59 = vmax.f32 %v1343_v24, %v1462_v40  ;;  %v1472_v60 = vmax.f32 %v1345_v25, %v1464_v41  ;;  %v1466_v61 = vmax.f32 %v1416_v55, 0.0  ;;  %v1468_v45 = vmax.f32 %v1459_v16, 0.0  ;;  %1511 = sbr.rel (!%p1979_p6) target bundleno = 356 (0x164), region = 67 }
 0x156   : > { %v1473_v62 = vmax.f32 %v1346_v28, %v1465_v57  ;;  %v1475_v46 = vmax.f32 %v1348_v29, %v1467_v58 }
 0x157   : > { %v1744_v63 = vpack.c.bf16 %v1470_v59, %v1469_v56  ;;  %v1745_v0 = vpack.c.bf16 %v1472_v60, %v1471_v43  ;;  %v1474_v1 = vmax.f32 %v1347_v30, %v1466_v61  ;;  %v1476_v2 = vmax.f32 %v1349_v31, %v1468_v45 }
 0x159   : > { %1501 = vst [vmem:[%s312_s18] sm:$0xff] %v1744_v63  ;;  %1502 = vst [vmem:[%s312_s18 + $0x8] sm:$0xff] %v1745_v0  ;;  %v1746_v51 = vpack.c.bf16 %v1474_v1, %v1473_v62  ;;  %v1747_v3 = vpack.c.bf16 %v1476_v2, %v1475_v46 }
 0x15b   : > { %1503 = vst [vmem:[%s312_s18 + $0x10] sm:$0xff] %v1746_v51  ;;  %1504 = vst [vmem:[%s312_s18 + $0x18] sm:$0xff] %v1747_v3 }
 0x160   : > { %v1529_v52 = vld [vmem:[%s312_s18] sm:$0xff]  ;;  %v1531_v4 = vld [vmem:[%s312_s18 + $0x8] sm:$0xff] }
 0x161   : > { %1530 = vst [vmem:[%s1516_s16] sm:$0xff] %v1529_v52  ;;  %1532 = vst [vmem:[%s1516_s16 + $0x8] sm:$0xff] %v1531_v4 }
 0x162   : > { %v1533_v5 = vld [vmem:[%s312_s18 + $0x10] sm:$0xff]  ;;  %v1535_v6 = vld [vmem:[%s312_s18 + $0x18] sm:$0xff] }
 0x163   : > { %1534 = vst [vmem:[%s1516_s16 + $0x20] sm:$0xff] %v1533_v5  ;;  %1536 = vst [vmem:[%s1516_s16 + $0x28] sm:$0xff] %v1535_v6 }
 0x164 PF: > { %s15_s24 = sadd.s32 1, %s1898_s24   ;;  %s2267_s18 = smov %s1878_s19 }
 0x165   : > { %p12_p0 = scmp.ge.s32.totalorder %s15_s24, 6   ;;  %s2268_s19 = smov %s1987_s8 }
 0x166   : > { %s2269_s20 = smov %s1890_s22  ;;  %s2270_s21 = smov %s1894_s23 }
 0x167   : > { %s2271_s22 = smov %s2274_s25  ;;  %s2272_s23 = smov %s2278_s26 }
 0x168   :  { %14 = sbr.rel (!%p12_p0) target bundleno = 4 (0x4), region = 131 }

// kernel: _lambda_.3
= control target key start
LH: loop header
LB: loop body
LE: loop exit
PB: predicated region body
PF: predicated region fallthrough
CT: control target
= control target key end

     0   :  { %s2737_s0 = inlined_call_operand.vmem [shape: bf16[2,8,16,1024], index: 0, kind: input, shape index: {}]   ;;  %s2738_s1 = inlined_call_operand.vmem [shape: bf16[2,16,1024], index: 1, kind: input, shape index: {}]   ;;  %s2739_s2 = inlined_call_operand.vmem [shape: bf16[2,8,1024], index: 2, kind: input, shape index: {}]   ;;  %s2740_s3 = inlined_call_operand.vmem [shape: bf16[16,16], index: 3, kind: input, shape index: {}]   ;;  %s2741_s4 = inlined_call_operand.vmem [shape: bf16[16,16], index: 4, kind: input, shape index: {}]   ;;  %s2742_s5 = inlined_call_operand.vmem [shape: f32[16,1], index: 5, kind: input, shape index: {}]   ;;  %s2743_s6 = inlined_call_operand.vmem [shape: bf16[16,8], index: 6, kind: input, shape index: {}]   ;;  %s2744_s7 = inlined_call_operand.hbm [shape: f32[2,16,1024], index: 7, kind: output, shape index: {}]  }
   0x1   :  { %2746 = sst [smem:[#allocation8_spill]] %s2737_s0 }
   0x2   :  { %12 = vsyncpa [#allocation5], 0 }
   0x3   :  { %14 = vsyncpa [#allocation5 + $0x1], 0  ;;  %s2299_s24 = smov 0   ;;  %s2301_s25 = smov 0  }
   0x4   :  { %s2303_s26 = smov 0   ;;  %s2305_s27 = smov 0  }
   0x5   :  { %s2307_s28 = smov 0   ;;  %s2309_s29 = smov 0  }
   0x6   :  { %s2311_s30 = smov 0   ;;  %s2313_s8 = smov 0  }
   0x7 LB: > { %s1903_s9 = sadd.s32 4294967295, %s2252_s8   ;;  %s1904_s10 = sadd.s32 4294967294, %s2252_s8   ;;  %s2252_s8 = sphi %s2313_s8, %s20_s8   ;;  %s2248_s30 = sphi %s2311_s30, %s2759_s30   ;;  %s2244_s29 = sphi %s2309_s29, %s2758_s29   ;;  %s2240_s28 = sphi %s2307_s28, %s2757_s28   ;;  %s2236_s27 = sphi %s2305_s27, %s2756_s27   ;;  %s2232_s26 = sphi %s2303_s26, %s2755_s26   ;;  %s2228_s25 = sphi %s2301_s25, %s2754_s25   ;;  %s2224_s24 = sphi %s2299_s24, %s2753_s24  }
   0x8   : > { %s29_s11 = sadd.s32 1, %s2244_s29  ;;  %s32_s12 = sadd.s32 1, %s2248_s30 }
   0x9   : > { %p30_p0 = scmp.ge.s32.totalorder %s29_s11, 2  ;;  %p48_p1 = scmp.ne.s32.totalorder %s2232_s26, %s2228_s25 }
   0xa   : > { %p49_p2 = scmp.eq.s32.totalorder %s2252_s8, 0  ;;  %p220_p5 = scmp.eq.s32.totalorder %s1903_s9, 3 }
   0xb   : > { %s2761_s11 = smov (%p30_p0, %s29_s11), 0  ;;  %s2763_s12 = smov (!%p30_p0, %s32_s12), %s2248_s30 }
   0xc   : > { %s37_s13 = ssub.s32 %s2244_s29, %s2761_s11  ;;  %p2351_p3 = por %p49_p2, %p48_p1 }
   0xd   : > { %p34_p4 = scmp.ge.s32.totalorder %s2763_s12, 2  ;;  %p225_p6 = scmp.ne.s32.totalorder %s2228_s25, %s2224_s24 }
   0xe   : > { %p226_p7 = scmp.eq.s32.totalorder %s1904_s10, 3  ;;  %p2359_p8 = por %p220_p5, %p48_p1 }
   0xf   : > { %s2765_s12 = smov (%p34_p4, %s2763_s12), 0  ;;  %s41_s19 = sadd.s32 1, %s2232_s26 }
  0x10   : > { %2748 = sst [smem:[#allocation7_spill]] %s2765_s12  ;;  %p2363_p9 = por %p226_p7, %p225_p6 }
  0x11   : > { %s36_s17 = ssub.s32 %s2248_s30, %s2765_s12  ;;  %p1906_p11 = scmp.ge.s32.totalorder %s2252_s8, 4 }
  0x12   : > { %s38_s18 = sor.u32 %s37_s13, %s36_s17 }
  0x13   : > { %p39_p10 = scmp.eq.s32.totalorder %s38_s18, 0  ;;  %254 = sbr.rel (%p1906_p11) target bundleno = 61 (0x3d), region = 32 }
  0x15   : > { %s2371_s20 = scalar_select %p39_p10, %s2232_s26, %s41_s19  }
  0x1a   : > { %257 = sbr.rel (!%p2351_p3) target bundleno = 52 (0x34), region = 36  ;;  %s259_s21 = sand.u32 (%p2351_p3), 1, %s2232_s26  }
  0x1b   : > { %s1908_s22 = sshll.u32 (%p2351_p3), %s2244_s29, 2  ;;  %s1907_s23 = sshll.u32 (%p2351_p3), %s259_s21, 8 }
  0x1c   : > { %s1909_s9 = sshll.u32 (%p2351_p3), %s2248_s30, 7  ;;  %s2751_s0 = sld [smem:[#allocation8_spill]] (%p2351_p3) }
  0x1d   : > { %s264_s10 = sadd.s32 (%p2351_p3), %s1909_s9, %s1908_s22  ;;  %s2387_s19 = scalar_lea.vmem (%p2351_p3), [#allocation2], %s1907_s23 }
  0x1e   : > { %s1910_s12 = sshll.u32 (%p2351_p3), %s264_s10, 2 }
  0x22   : > { %s2382_s18 = scalar_lea.vmem %s2751_s0, %s1910_s12 }
  0x23   : > { %v279_v0 = vld [vmem:[%s2382_s18] sm:$0xff]  ;;  %v281_v1 = vld [vmem:[%s2382_s18 + $0x8] sm:$0xff] }
  0x24   : > { %v283_v2 = vld [vmem:[%s2382_s18 + $0x20] sm:$0xff]  ;;  %280 = vst [vmem:[%s2387_s19] sm:$0xff] %v279_v0  ;;  %282 = vst [vmem:[%s2387_s19 + $0x8] sm:$0xff] %v281_v1  ;;  %v285_v3 = vld [vmem:[%s2382_s18 + $0x28] sm:$0xff] }
  0x25   : > { %284 = vst [vmem:[%s2387_s19 + $0x10] sm:$0xff] %v283_v2  ;;  %v287_v4 = vld [vmem:[%s2382_s18 + $0x40] sm:$0xff]  ;;  %v289_v5 = vld [vmem:[%s2382_s18 + $0x48] sm:$0xff]  ;;  %286 = vst [vmem:[%s2387_s19 + $0x18] sm:$0xff] %v285_v3 }
  0x26   : > { %288 = vst [vmem:[%s2387_s19 + $0x20] sm:$0xff] %v287_v4  ;;  %290 = vst [vmem:[%s2387_s19 + $0x28] sm:$0xff] %v289_v5  ;;  %v291_v6 = vld [vmem:[%s2382_s18 + $0x60] sm:$0xff]  ;;  %v293_v7 = vld [vmem:[%s2382_s18 + $0x68] sm:$0xff] }
  0x27   : > { %v295_v8 = vld [vmem:[%s2382_s18 + $0x80] sm:$0xff]  ;;  %292 = vst [vmem:[%s2387_s19 + $0x30] sm:$0xff] %v291_v6  ;;  %294 = vst [vmem:[%s2387_s19 + $0x38] sm:$0xff] %v293_v7  ;;  %v297_v9 = vld [vmem:[%s2382_s18 + $0x88] sm:$0xff] }
  0x28   : > { %296 = vst [vmem:[%s2387_s19 + $0x40] sm:$0xff] %v295_v8  ;;  %v299_v10 = vld [vmem:[%s2382_s18 + $0xa0] sm:$0xff]  ;;  %v301_v11 = vld [vmem:[%s2382_s18 + $0xa8] sm:$0xff]  ;;  %298 = vst [vmem:[%s2387_s19 + $0x48] sm:$0xff] %v297_v9 }
  0x29   : > { %300 = vst [vmem:[%s2387_s19 + $0x50] sm:$0xff] %v299_v10  ;;  %302 = vst [vmem:[%s2387_s19 + $0x58] sm:$0xff] %v301_v11  ;;  %v303_v12 = vld [vmem:[%s2382_s18 + $0xc0] sm:$0xff]  ;;  %v305_v13 = vld [vmem:[%s2382_s18 + $0xc8] sm:$0xff] }
  0x2a   : > { %v307_v14 = vld [vmem:[%s2382_s18 + $0xe0] sm:$0xff]  ;;  %304 = vst [vmem:[%s2387_s19 + $0x60] sm:$0xff] %v303_v12  ;;  %306 = vst [vmem:[%s2387_s19 + $0x68] sm:$0xff] %v305_v13  ;;  %v309_v15 = vld [vmem:[%s2382_s18 + $0xe8] sm:$0xff] }
  0x2b   : > { %308 = vst [vmem:[%s2387_s19 + $0x70] sm:$0xff] %v307_v14  ;;  %v311_v16 = vld [vmem:[%s2382_s18 + $0x100] sm:$0xff]  ;;  %v313_v17 = vld [vmem:[%s2382_s18 + $0x108] sm:$0xff]  ;;  %310 = vst [vmem:[%s2387_s19 + $0x78] sm:$0xff] %v309_v15 }
  0x2c   : > { %312 = vst [vmem:[%s2387_s19 + $0x80] sm:$0xff] %v311_v16  ;;  %314 = vst [vmem:[%s2387_s19 + $0x88] sm:$0xff] %v313_v17  ;;  %v315_v18 = vld [vmem:[%s2382_s18 + $0x120] sm:$0xff]  ;;  %v317_v19 = vld [vmem:[%s2382_s18 + $0x128] sm:$0xff] }
  0x2d   : > { %v319_v20 = vld [vmem:[%s2382_s18 + $0x140] sm:$0xff]  ;;  %316 = vst [vmem:[%s2387_s19 + $0x90] sm:$0xff] %v315_v18  ;;  %318 = vst [vmem:[%s2387_s19 + $0x98] sm:$0xff] %v317_v19  ;;  %v321_v21 = vld [vmem:[%s2382_s18 + $0x148] sm:$0xff] }
  0x2e   : > { %320 = vst [vmem:[%s2387_s19 + $0xa0] sm:$0xff] %v319_v20  ;;  %v323_v22 = vld [vmem:[%s2382_s18 + $0x160] sm:$0xff]  ;;  %v325_v23 = vld [vmem:[%s2382_s18 + $0x168] sm:$0xff]  ;;  %322 = vst [vmem:[%s2387_s19 + $0xa8] sm:$0xff] %v321_v21 }
  0x2f   : > { %324 = vst [vmem:[%s2387_s19 + $0xb0] sm:$0xff] %v323_v22  ;;  %326 = vst [vmem:[%s2387_s19 + $0xb8] sm:$0xff] %v325_v23  ;;  %v327_v24 = vld [vmem:[%s2382_s18 + $0x180] sm:$0xff]  ;;  %v329_v25 = vld [vmem:[%s2382_s18 + $0x188] sm:$0xff] }
  0x30   : > { %v331_v26 = vld [vmem:[%s2382_s18 + $0x1a0] sm:$0xff]  ;;  %328 = vst [vmem:[%s2387_s19 + $0xc0] sm:$0xff] %v327_v24  ;;  %330 = vst [vmem:[%s2387_s19 + $0xc8] sm:$0xff] %v329_v25  ;;  %v333_v27 = vld [vmem:[%s2382_s18 + $0x1a8] sm:$0xff] }
  0x31   : > { %332 = vst [vmem:[%s2387_s19 + $0xd0] sm:$0xff] %v331_v26  ;;  %v335_v28 = vld [vmem:[%s2382_s18 + $0x1c0] sm:$0xff]  ;;  %v337_v29 = vld [vmem:[%s2382_s18 + $0x1c8] sm:$0xff]  ;;  %334 = vst [vmem:[%s2387_s19 + $0xd8] sm:$0xff] %v333_v27 }
  0x32   : > { %336 = vst [vmem:[%s2387_s19 + $0xe0] sm:$0xff] %v335_v28  ;;  %338 = vst [vmem:[%s2387_s19 + $0xe8] sm:$0xff] %v337_v29  ;;  %v339_v30 = vld [vmem:[%s2382_s18 + $0x1e0] sm:$0xff]  ;;  %v341_v31 = vld [vmem:[%s2382_s18 + $0x1e8] sm:$0xff] }
  0x33   : > { %340 = vst [vmem:[%s2387_s19 + $0xf0] sm:$0xff] %v339_v30  ;;  %342 = vst [vmem:[%s2387_s19 + $0xf8] sm:$0xff] %v341_v31 }
  0x34 PF: > { %348 = sbr.rel (!%p2351_p3) target bundleno = 61 (0x3d), region = 59  ;;  %s350_s12 = sand.u32 (%p2351_p3), 1, %s2232_s26  }
  0x35   : > { %s1912_s21 = sshll.u32 (%p2351_p3), %s2244_s29, 2  ;;  %s1911_s22 = sshll.u32 (%p2351_p3), %s350_s12, 5 }
  0x36   : > { %s1913_s23 = sshll.u32 (%p2351_p3), %s2248_s30, 4  ;;  %s352_s18 = scalar_lea.vmem (%p2351_p3), [#allocation3], %s1911_s22 }
  0x37   : > { %s355_s9 = sadd.s32 (%p2351_p3), %s1913_s23, %s1912_s21 }
  0x38   : > { %s1914_s10 = sshll.u32 (%p2351_p3), %s355_s9, 2 }
  0x39   : > { %s357_s0 = scalar_lea.vmem (%p2351_p3), %s2738_s1, %s1914_s10 }
  0x3a   : > { %v370_v32 = vld [vmem:[%s357_s0] sm:$0xff] (%p2351_p3)  ;;  %v372_v33 = vld [vmem:[%s357_s0 + $0x8] sm:$0xff] (%p2351_p3) }
  0x3b   : > { %v374_v34 = vld [vmem:[%s357_s0 + $0x20] sm:$0xff]  ;;  %371 = vst [vmem:[%s352_s18] sm:$0xff] %v370_v32  ;;  %373 = vst [vmem:[%s352_s18 + $0x8] sm:$0xff] %v372_v33  ;;  %v376_v35 = vld [vmem:[%s357_s0 + $0x28] sm:$0xff] }
  0x3c   : > { %375 = vst [vmem:[%s352_s18 + $0x10] sm:$0xff] %v374_v34  ;;  %377 = vst [vmem:[%s352_s18 + $0x18] sm:$0xff] %v376_v35 }
  0x3d PF: > { %p1915_p12 = scmp.ge.s32.totalorder %s2252_s8, 1  ;;  %p395_p13 = scmp.lt.s32.totalorder %s2252_s8, 5 }
  0x3f   : > { %p396_p0 = pnand %p1915_p12, %p395_p13 }
  0x40   : > { %s2461_s14 = sand.u32 (!%p396_p0), 1, %s2228_s25   ;;  %v2254_v36 = vmov (!%p396_p0), 0   ;;  %v2103_v39 = vld [vmem:[%s2741_s4] sm:$0xff] (!%p396_p0)   ;;  %vm510_vm0 = vcmask (!%p396_p0), 130048   ;;  %v474_v62 = vld [vmem:[%s2742_s5 + $0x8] sm:$0xff] (!%p396_p0)  ;;  %p456_p1 = scmp.lt.s32.totalorder (!%p396_p0), %s2240_s28, 1 }
  0x41   : > { %399 = sbr.rel (%p396_p0) target bundleno = 380 (0x17c), region = 86  ;;  %s1916_s19 = sshll.u32 (!%p396_p0), %s2461_s14, 8  ;;  %546 = vmatprep.mubr.bf16.mxu0 (!%p396_p0), %v2254_v36  ;;  %589 = vmatprep.mubr.bf16.mxu1 (!%p396_p0), %v2254_v36  ;;  %v2486_v48 = vld [vmem:[%s2740_s3] sm:$0xff] (!%p396_p0)   ;;  %vm1640_vm1 = vcmask (!%p396_p0), 1043456   ;;  %vm1636_vm2 = vcmask (!%p396_p0), 64512  }
  0x42   : > { %s1917_s12 = sshll.u32 (!%p396_p0), %s2461_s14, 5  ;;  %2096 = vset.pattern.permute.xlu0 (!%p396_p0), %v2254_v36  ;;  %s2471_s23 = scalar_lea.vmem (!%p396_p0), [#allocation2], %s1916_s19  ;;  %v473_v57 = vld [vmem:[%s2742_s5] sm:$0xff] (!%p396_p0) }
  0x43   : > { %s411_s0 = scalar_lea.vmem (!%p396_p0), [#allocation3], %s1917_s12  ;;  %v2104_v42 = vld [vmem:[%s2471_s23] ss:$16 sps:$4 sm:$0xff] (!%p396_p0)   ;;  %v2106_v43 = vld [vmem:[%s2471_s23 + $0x4] ss:$16 sps:$4 sm:$0xff] (!%p396_p0)   ;;  %477 = vperm.xlu0 (!%p396_p0), %2096, %v473_v57   ;;  %s2533_s12 = sshll.u32 (!%p396_p0), %s2236_s27, 2 }
  0x44   : > { %v2097_v37 = vld [vmem:[%s411_s0 + $0x4] ss:$16 sps:$4 sm:$0xff] (!%p396_p0)   ;;  %v2099_v38 = vld [vmem:[%s411_s0 + $0xc] ss:$16 sps:$4 sm:$0xff] (!%p396_p0)   ;;  %v2101_v40 = vld [vmem:[%s411_s0] ss:$16 sps:$4 sm:$0xff] (!%p396_p0)  }
  0x45   : > { %514 = vmatprep.subr.bf16.mxu0 (!%p396_p0), %v2097_v37  ;;  %v2102_v41 = vld [vmem:[%s411_s0 + $0x8] ss:$16 sps:$4 sm:$0xff] (!%p396_p0)   ;;  %557 = vmatprep.subr.bf16.mxu1 (!%p396_p0), %v2099_v38  ;;  %v2109_v45 = vld [vmem:[%s2471_s23 + $0xc] ss:$16 sps:$4 sm:$0xff] (!%p396_p0)   ;;  %v2113_v46 = vld [vmem:[%s2471_s23 + $0x24] ss:$16 sps:$4 sm:$0xff] (!%p396_p0)  }
  0x46   : > { %515 = vmatpush1.bf16.msra.mxu0 (!%p396_p0), %v2101_v40  ;;  %558 = vmatpush1.bf16.msra.mxu1 (!%p396_p0), %v2102_v41  ;;  %v2107_v44 = vld [vmem:[%s2471_s23 + $0x8] ss:$16 sps:$4 sm:$0xff] (!%p396_p0)   ;;  %v2116_v47 = vld [vmem:[%s2471_s23 + $0x2c] ss:$16 sps:$4 sm:$0xff] (!%p396_p0)   ;;  %v2111_v49 = vld [vmem:[%s2471_s23 + $0x20] ss:$16 sps:$4 sm:$0xff] (!%p396_p0)  }
  0x47   : > { %634 = vmatprep.subr.bf16.mxu0 (!%p396_p0), %v2106_v43  ;;  %677 = vmatprep.subr.bf16.mxu1 (!%p396_p0), %v2109_v45  ;;  %v2114_v50 = vld [vmem:[%s2471_s23 + $0x28] ss:$16 sps:$4 sm:$0xff] (!%p396_p0)   ;;  %v2119_v51 = vld [vmem:[%s2471_s23 + $0x44] ss:$16 sps:$4 sm:$0xff] (!%p396_p0)   ;;  %v2122_v52 = vld [vmem:[%s2471_s23 + $0x4c] ss:$16 sps:$4 sm:$0xff] (!%p396_p0)  }
  0x48   : > { %v2117_v53 = vld [vmem:[%s2471_s23 + $0x40] ss:$16 sps:$4 sm:$0xff]   ;;  %v2120_v54 = vld [vmem:[%s2471_s23 + $0x48] ss:$16 sps:$4 sm:$0xff]   ;;  %v2125_v55 = vld [vmem:[%s2471_s23 + $0x64] ss:$16 sps:$4 sm:$0xff]   ;;  %482 = vperm.xlu0 %2096, %v474_v62  }
  0x49   : > { %1927 = vmatmul.mubr.msk.bf16.vlgmr.msra.gmra.mrb[0].mxu0 %vm510_vm0, %v2103_v39  ;;  %1928 = vmatmul.mubr.msk.bf16.vlgmr.msra.gmra.mrb[0].mxu1 %vm510_vm0, %v2103_v39  ;;  %v2128_v56 = vld [vmem:[%s2471_s23 + $0x6c] ss:$16 sps:$4 sm:$0xff]   ;;  %v2123_v58 = vld [vmem:[%s2471_s23 + $0x60] ss:$16 sps:$4 sm:$0xff]   ;;  %v2126_v59 = vld [vmem:[%s2471_s23 + $0x68] ss:$16 sps:$4 sm:$0xff]  }
  0x4a   : > { %635 = vmatpush1.bf16.msra.mxu0 %v2104_v42  ;;  %678 = vmatpush1.bf16.msra.mxu1 %v2107_v44  ;;  %v2131_v60 = vld [vmem:[%s2471_s23 + $0x84] ss:$16 sps:$4 sm:$0xff]   ;;  %v2134_v61 = vld [vmem:[%s2471_s23 + $0x8c] ss:$16 sps:$4 sm:$0xff]   ;;  %v2129_v63 = vld [vmem:[%s2471_s23 + $0x80] ss:$16 sps:$4 sm:$0xff]  }
  0x4b   : > { %666 = vmatprep.mubr.bf16.mxu0 %v2254_v36  ;;  %709 = vmatprep.mubr.bf16.mxu1 %v2254_v36  ;;  %v2132_v0 = vld [vmem:[%s2471_s23 + $0x88] ss:$16 sps:$4 sm:$0xff]   ;;  %v2137_v1 = vld [vmem:[%s2471_s23 + $0xa4] ss:$16 sps:$4 sm:$0xff]   ;;  %v2140_v2 = vld [vmem:[%s2471_s23 + $0xac] ss:$16 sps:$4 sm:$0xff]  }
  0x4c   : > { %753 = vmatprep.subr.bf16.mxu0 %v2113_v46  ;;  %796 = vmatprep.subr.bf16.mxu1 %v2116_v47  ;;  %p458_p2 = scmp.lt.s32.totalorder %s2533_s12, 7  ;;  %v2135_v3 = vld [vmem:[%s2471_s23 + $0xa0] ss:$16 sps:$4 sm:$0xff]   ;;  %v2138_v4 = vld [vmem:[%s2471_s23 + $0xa8] ss:$16 sps:$4 sm:$0xff]   ;;  %s2017_s19 = sshll.u32 %s2240_s28, 4 }
  0x4d   : > { %s457_s0 = scalar_select %p456_p1, %s2240_s28, 1  ;;  %v2143_v5 = vld [vmem:[%s2471_s23 + $0xc4] ss:$16 sps:$4 sm:$0xff]   ;;  %v2146_v6 = vld [vmem:[%s2471_s23 + $0xcc] ss:$16 sps:$4 sm:$0xff]  }
  0x4e   : > { %s459_s27 = scalar_select %p458_p2, %s2533_s12, 7  ;;  %v2141_v7 = vld [vmem:[%s2471_s23 + $0xc0] ss:$16 sps:$4 sm:$0xff]   ;;  %v2144_v8 = vld [vmem:[%s2471_s23 + $0xc8] ss:$16 sps:$4 sm:$0xff]  }
  0x4f   : > { %s1920_s21 = sshll.u32 %s457_s0, 3  ;;  %v2149_v9 = vld [vmem:[%s2471_s23 + $0xe4] ss:$16 sps:$4 sm:$0xff]   ;;  %v2152_v10 = vld [vmem:[%s2471_s23 + $0xec] ss:$16 sps:$4 sm:$0xff]   ;;  %s1918_s0 = sshll.u32 %s2461_s14, 6 }
  0x50   : > { %s461_s22 = sadd.s32 %s1920_s21, %s459_s27  ;;  %v2147_v13 = vld [vmem:[%s2471_s23 + $0xe0] ss:$16 sps:$4 sm:$0xff]   ;;  %v2150_v14 = vld [vmem:[%s2471_s23 + $0xe8] ss:$16 sps:$4 sm:$0xff]   ;;  %s2664_s27 = sadd.s32 %s2017_s19, %s2533_s12 }
  0x51   : > { %1934 = vmatmul.mubr.msk.bf16.vlgmr.msra.gmra.mrb[4].mxu0 %vm510_vm0, %v2486_v48  ;;  %1935 = vmatmul.mubr.msk.bf16.vlgmr.msra.gmra.mrb[4].mxu1 %vm510_vm0, %v2486_v48  ;;  %s1921_s9 = sshll.u32 %s461_s22, 2  ;;  %v2157_v21 = vld [vmem:[%s2743_s6] sm:$0xff]   ;;  %s2666_s28 = scalar_lea.vmem [#allocation4], %s1918_s0 }
  0x52   : > { %754 = vmatpush1.bf16.msra.mxu0 %v2111_v49  ;;  %797 = vmatpush1.bf16.msra.mxu1 %v2114_v50  ;;  %s463_s17 = scalar_lea.vmem %s2739_s2, %s1921_s9  ;;  %s1779_s21 = sshll.u32 %s2666_s28, 4  ;;  %s2670_s21 = int_to_ptr.vmem [resolvable:$true] %s1779_s21 }
  0x53   : > { %785 = vmatprep.mubr.bf16.mxu0 %v2254_v36  ;;  %828 = vmatprep.mubr.bf16.mxu1 %v2254_v36  ;;  %v1619_v11 = vld [vmem:[%s463_s17] sm:$0xff]  ;;  %v1620_v12 = vld [vmem:[%s463_s17 + $0x8] sm:$0xff]  ;;  %s2018_s22 = sshll.u32 %s2664_s27, 7  ;;  %s1764_s13 = scalar_lea.sflag [#allocation5], %s2461_s14 }
  0x54   : > { %880 = vmatprep.subr.bf16.mxu0 %v2119_v51  ;;  %923 = vmatprep.subr.bf16.mxu1 %v2122_v52  ;;  %v2008_v15 = vcombine.high %v1619_v11, %v1619_v11  ;;  %v2010_v16 = vcombine.high %v1620_v12, %v1620_v12  ;;  %v2007_v17 = vcombine.low %v1619_v11, %v1619_v11  ;;  %s2675_s10 = scalar_lea.hbm %s2744_s7, %s2018_s22  ;;  %s2158_s17 = scalar_lea.vmem %s2670_s21, 1024 }
  0x55   : > { %v2009_v18 = vcombine.low %v1620_v12, %v1620_v12  ;;  %p2159_p3 = scmp.ne.s32.totalorder %s2670_s21, %s2158_s17  ;;  %s2255_s23 = smov [#allocation4]  }
  0x56   : > { %v1642_v19 = vsel %vm1640_vm1, %v2007_v17, 0  ;;  %s2162_s18 = sshll.u32 %s2255_s23, 4  ;;  %s2163_s18 = int_to_ptr.vmem [resolvable:$false] %s2162_s18 }
  0x57   : > { %v1648_v20 = vsel %vm1640_vm1, %v2009_v18, 0  ;;  %p2160_p4 = pnand %p2159_p3, %p2359_p8  ;;  %s2164_s19 = scalar_lea.vmem %s2163_s18, 2048 }
  0x58   : > { %p2165_p6 = scmp.lt.s32.totalorder %s2670_s21, %s2163_s18  ;;  %p2166_p7 = scmp.lt.s32.totalorder %s2164_s19, %s2158_s17 }
  0x59   : > { %1944 = vmatmul.mubr.msk.bf16.vlgmr.msra.gmra.mrb[8].mxu0 %vm510_vm0, %v2486_v48  ;;  %1945 = vmatmul.mubr.msk.bf16.vlgmr.msra.gmra.mrb[8].mxu1 %vm510_vm0, %v2486_v48  ;;  %p2161_p5 = pneg %p2160_p4 }
  0x5a   : > { %881 = vmatpush1.bf16.msra.mxu0 %v2117_v53  ;;  %924 = vmatpush1.bf16.msra.mxu1 %v2120_v54  ;;  %p2167_p10 = por %p2166_p7, %p2165_p6 }
  0x5b   : > { %912 = vmatprep.mubr.bf16.mxu0 %v2254_v36  ;;  %955 = vmatprep.mubr.bf16.mxu1 %v2254_v36 }
  0x5c   : > { %1007 = vmatprep.subr.bf16.mxu0 %v2125_v55  ;;  %1050 = vmatprep.subr.bf16.mxu1 %v2128_v56  ;;  %p2168_p11 = pnand %p2167_p10, %p2161_p5 }
  0x61   : > { %1954 = vmatmul.mubr.msk.bf16.vlgmr.msra.gmra.mrb[12].mxu0 %vm510_vm0, %v2486_v48  ;;  %1955 = vmatmul.mubr.msk.bf16.vlgmr.msra.gmra.mrb[12].mxu1 %vm510_vm0, %v2486_v48 }
  0x62   : > { %1008 = vmatpush1.bf16.msra.mxu0 %v2123_v58  ;;  %1051 = vmatpush1.bf16.msra.mxu1 %v2126_v59 }
  0x63   : > { %1039 = vmatprep.mubr.bf16.mxu0 %v2254_v36  ;;  %1082 = vmatprep.mubr.bf16.mxu1 %v2254_v36 }
  0x64   : > { %1134 = vmatprep.subr.bf16.mxu0 %v2131_v60  ;;  %1177 = vmatprep.subr.bf16.mxu1 %v2134_v61 }
  0x69   : > { %1964 = vmatmul.mubr.msk.bf16.vlgmr.msra.gmra.mrb[16].mxu0 %vm510_vm0, %v2486_v48  ;;  %1965 = vmatmul.mubr.msk.bf16.vlgmr.msra.gmra.mrb[16].mxu1 %vm510_vm0, %v2486_v48 }
  0x6a   : > { %1135 = vmatpush1.bf16.msra.mxu0 %v2129_v63  ;;  %1178 = vmatpush1.bf16.msra.mxu1 %v2132_v0 }
  0x6b   : > { %1166 = vmatprep.mubr.bf16.mxu0 %v2254_v36  ;;  %1209 = vmatprep.mubr.bf16.mxu1 %v2254_v36 }
  0x6c   : > { %1261 = vmatprep.subr.bf16.mxu0 %v2137_v1  ;;  %1304 = vmatprep.subr.bf16.mxu1 %v2140_v2 }
  0x71   : > { %1974 = vmatmul.mubr.msk.bf16.vlgmr.msra.gmra.mrb[20].mxu0 %vm510_vm0, %v2486_v48  ;;  %1975 = vmatmul.mubr.msk.bf16.vlgmr.msra.gmra.mrb[20].mxu1 %vm510_vm0, %v2486_v48 }
  0x72   : > { %1262 = vmatpush1.bf16.msra.mxu0 %v2135_v3  ;;  %1305 = vmatpush1.bf16.msra.mxu1 %v2138_v4 }
  0x73   : > { %1293 = vmatprep.mubr.bf16.mxu0 %v2254_v36  ;;  %1336 = vmatprep.mubr.bf16.mxu1 %v2254_v36 }
  0x74   : > { %1388 = vmatprep.subr.bf16.mxu0 %v2143_v5  ;;  %1431 = vmatprep.subr.bf16.mxu1 %v2146_v6 }
  0x79   : > { %1984 = vmatmul.mubr.msk.bf16.vlgmr.msra.gmra.mrb[24].mxu0 %vm510_vm0, %v2486_v48  ;;  %1985 = vmatmul.mubr.msk.bf16.vlgmr.msra.gmra.mrb[24].mxu1 %vm510_vm0, %v2486_v48 }
  0x7a   : > { %1389 = vmatpush1.bf16.msra.mxu0 %v2141_v7  ;;  %1432 = vmatpush1.bf16.msra.mxu1 %v2144_v8 }
  0x7b   : > { %1420 = vmatprep.mubr.bf16.mxu0 %v2254_v36  ;;  %1463 = vmatprep.mubr.bf16.mxu1 %v2254_v36 }
  0x7c   : > { %1515 = vmatprep.subr.bf16.mxu0 %v2149_v9  ;;  %1558 = vmatprep.subr.bf16.mxu1 %v2152_v10 }
  0x81   : > { %1994 = vmatmul.mubr.msk.bf16.vlgmr.msra.gmra.mrb[28].mxu0 %vm510_vm0, %v2486_v48  ;;  %1995 = vmatmul.mubr.msk.bf16.vlgmr.msra.gmra.mrb[28].mxu1 %vm510_vm0, %v2486_v48 }
  0x82   : > { %1516 = vmatpush1.bf16.msra.mxu0 %v2147_v13  ;;  %1559 = vmatpush1.bf16.msra.mxu1 %v2150_v14 }
  0x83   : > { %1547 = vmatprep.mubr.bf16.mxu0 %v2254_v36  ;;  %1590 = vmatprep.mubr.bf16.mxu1 %v2254_v36 }
  0x84   : > { %2011 = vmatprep.subr.msk.bf16.mxu0 %vm1640_vm1, %v2008_v15  ;;  %2013 = vmatprep.subr.msk.bf16.mxu1 %vm1640_vm1, %v2010_v16 }
  0x89   : > { %2004 = vmatmul.mubr.msk.bf16.vlgmr.msra.gmra.mrb[32].mxu0 %vm510_vm0, %v2486_v48  ;;  %2005 = vmatmul.mubr.msk.bf16.vlgmr.msra.gmra.mrb[32].mxu1 %vm510_vm0, %v2486_v48 }
  0x8a   : > { %1654 = vmatpush1.bf16.msra.mxu0 %v1642_v19  ;;  %1697 = vmatpush1.bf16.msra.mxu1 %v1648_v20 }
  0x8b   : > { %1685 = vmatprep.mubr.bf16.mxu0 %v2254_v36  ;;  %1728 = vmatprep.mubr.bf16.mxu1 %v2254_v36 }
  0x91   : > { %2012 = vmatmul.mubr.msk.bf16.vlgmr.msra.gmra.mrb[36].mxu0 %vm1636_vm2, %v2157_v21  ;;  %2014 = vmatmul.mubr.msk.bf16.vlgmr.msra.gmra.mrb[36].mxu1 %vm1636_vm2, %v2157_v21 }
  0xc2   : > { %v478_v22 = vpop.permute.xlu0 %477 }
  0xc7   : > { %v483_v31 = vpop.permute.xlu0 %482 }
 0x11c   : > { %v548_v23 = vpop.f32.mrb[0].mxu0  ;;  %v591_v24 = vpop.f32.mrb[0].mxu1 }
 0x11d   : > { %v550_v25 = vpop.f32.mrb[1].mxu0  ;;  %v593_v26 = vpop.f32.mrb[1].mxu1  ;;  %v2581_v32 = vadd.f32 %v548_v23, %v478_v22  ;;  %v2583_v33 = vadd.f32 %v591_v24, %v478_v22 }
 0x11e   : > { %v552_v27 = vpop.f32.mrb[2].mxu0  ;;  %v595_v28 = vpop.f32.mrb[2].mxu1  ;;  %v2585_v34 = vadd.f32 %v550_v25, %v478_v22  ;;  %v2587_v35 = vadd.f32 %v593_v26, %v478_v22 }
 0x11f   : > { %v554_v29 = vpop.f32.mrb[3].mxu0  ;;  %v597_v30 = vpop.f32.mrb[3].mxu1  ;;  %v2589_v38 = vadd.f32 %v552_v27, %v483_v31  ;;  %v2591_v39 = vadd.f32 %v595_v28, %v483_v31 }
 0x120   : > { %v2595_v44 = vadd.f32 %v554_v29, %v483_v31  ;;  %v2597_v45 = vadd.f32 %v597_v30, %v483_v31 }
 0x124   : > { %v668_v36 = vpop.f32.mrb[4].mxu0  ;;  %v711_v37 = vpop.f32.mrb[4].mxu1 }
 0x125   : > { %v669_v40 = vadd.f32 %v668_v36, %v2581_v32  ;;  %v712_v41 = vadd.f32 %v711_v37, %v2583_v33  ;;  %v670_v42 = vpop.f32.mrb[5].mxu0  ;;  %v713_v43 = vpop.f32.mrb[5].mxu1 }
 0x126   : > { %v671_v46 = vadd.f32 %v670_v42, %v2585_v34  ;;  %v714_v47 = vadd.f32 %v713_v43, %v2587_v35  ;;  %v672_v48 = vpop.f32.mrb[6].mxu0  ;;  %v715_v49 = vpop.f32.mrb[6].mxu1 }
 0x127   : > { %v673_v50 = vadd.f32 %v672_v48, %v2589_v38  ;;  %v716_v51 = vadd.f32 %v715_v49, %v2591_v39  ;;  %v674_v52 = vpop.f32.mrb[7].mxu0  ;;  %v717_v53 = vpop.f32.mrb[7].mxu1  ;;  %v720_v56 = vmax.f32 %v669_v40, 0.0  ;;  %v722_v57 = vmax.f32 %v712_v41, 0.0 }
 0x128   : > { %v675_v54 = vadd.f32 %v674_v52, %v2595_v44  ;;  %v718_v55 = vadd.f32 %v717_v53, %v2597_v45  ;;  %v721_v58 = vmax.f32 %v671_v46, 0.0  ;;  %v723_v59 = vmax.f32 %v714_v47, 0.0 }
 0x129   : > { %v724_v62 = vmax.f32 %v673_v50, 0.0  ;;  %v726_v63 = vmax.f32 %v716_v51, 0.0 }
 0x12a   : > { %v725_v4 = vmax.f32 %v675_v54, 0.0  ;;  %v727_v5 = vmax.f32 %v718_v55, 0.0 }
 0x12c   : > { %v787_v60 = vpop.f32.mrb[8].mxu0  ;;  %v830_v61 = vpop.f32.mrb[8].mxu1 }
 0x12d   : > { %v788_v0 = vadd.f32 %v787_v60, %v2581_v32  ;;  %v831_v1 = vadd.f32 %v830_v61, %v2583_v33  ;;  %v789_v2 = vpop.f32.mrb[9].mxu0  ;;  %v832_v3 = vpop.f32.mrb[9].mxu1 }
 0x12e   : > { %v790_v6 = vadd.f32 %v789_v2, %v2585_v34  ;;  %v833_v7 = vadd.f32 %v832_v3, %v2587_v35  ;;  %v791_v8 = vpop.f32.mrb[10].mxu0  ;;  %v834_v9 = vpop.f32.mrb[10].mxu1 }
 0x12f   : > { %v839_v10 = vmax.f32 %v788_v0, 0.0  ;;  %v841_v11 = vmax.f32 %v831_v1, 0.0  ;;  %v792_v12 = vadd.f32 %v791_v8, %v2589_v38  ;;  %v835_v13 = vadd.f32 %v834_v9, %v2591_v39  ;;  %v793_v14 = vpop.f32.mrb[11].mxu0  ;;  %v836_v15 = vpop.f32.mrb[11].mxu1 }
 0x130   : > { %v840_v16 = vmax.f32 %v790_v6, 0.0  ;;  %v842_v17 = vmax.f32 %v833_v7, 0.0  ;;  %v794_v18 = vadd.f32 %v793_v14, %v2595_v44  ;;  %v837_v19 = vadd.f32 %v836_v15, %v2597_v45 }
 0x131   : > { %v847_v20 = vmax.f32 %v720_v56, %v839_v10  ;;  %v849_v21 = vmax.f32 %v722_v57, %v841_v11  ;;  %v843_v22 = vmax.f32 %v792_v12, 0.0  ;;  %v845_v23 = vmax.f32 %v835_v13, 0.0 }
 0x132   : > { %v848_v24 = vmax.f32 %v721_v58, %v840_v16  ;;  %v850_v25 = vmax.f32 %v723_v59, %v842_v17  ;;  %v844_v26 = vmax.f32 %v794_v18, 0.0  ;;  %v846_v27 = vmax.f32 %v837_v19, 0.0 }
 0x133   : > { %v851_v28 = vmax.f32 %v724_v62, %v843_v22  ;;  %v853_v29 = vmax.f32 %v726_v63, %v845_v23 }
 0x134   : > { %v852_v30 = vmax.f32 %v725_v4, %v844_v26  ;;  %v854_v31 = vmax.f32 %v727_v5, %v846_v27  ;;  %v914_v36 = vpop.f32.mrb[12].mxu0  ;;  %v957_v37 = vpop.f32.mrb[12].mxu1 }
 0x135   : > { %v915_v40 = vadd.f32 %v914_v36, %v2581_v32  ;;  %v958_v41 = vadd.f32 %v957_v37, %v2583_v33  ;;  %v916_v42 = vpop.f32.mrb[13].mxu0  ;;  %v959_v43 = vpop.f32.mrb[13].mxu1 }
 0x136   : > { %v917_v46 = vadd.f32 %v916_v42, %v2585_v34  ;;  %v960_v47 = vadd.f32 %v959_v43, %v2587_v35  ;;  %v918_v48 = vpop.f32.mrb[14].mxu0  ;;  %v961_v49 = vpop.f32.mrb[14].mxu1 }
 0x137   : > { %v966_v50 = vmax.f32 %v915_v40, 0.0  ;;  %v968_v51 = vmax.f32 %v958_v41, 0.0  ;;  %v919_v52 = vadd.f32 %v918_v48, %v2589_v38  ;;  %v962_v53 = vadd.f32 %v961_v49, %v2591_v39  ;;  %v920_v54 = vpop.f32.mrb[15].mxu0  ;;  %v963_v55 = vpop.f32.mrb[15].mxu1 }
 0x138   : > { %v967_v56 = vmax.f32 %v917_v46, 0.0  ;;  %v969_v57 = vmax.f32 %v960_v47, 0.0  ;;  %v921_v58 = vadd.f32 %v920_v54, %v2595_v44  ;;  %v964_v59 = vadd.f32 %v963_v55, %v2597_v45 }
 0x139   : > { %v974_v60 = vmax.f32 %v847_v20, %v966_v50  ;;  %v976_v61 = vmax.f32 %v849_v21, %v968_v51  ;;  %v970_v62 = vmax.f32 %v919_v52, 0.0  ;;  %v972_v63 = vmax.f32 %v962_v53, 0.0 }
 0x13a   : > { %v975_v0 = vmax.f32 %v848_v24, %v967_v56  ;;  %v977_v1 = vmax.f32 %v850_v25, %v969_v57  ;;  %v971_v2 = vmax.f32 %v921_v58, 0.0  ;;  %v973_v3 = vmax.f32 %v964_v59, 0.0 }
 0x13b   : > { %v978_v4 = vmax.f32 %v851_v28, %v970_v62  ;;  %v980_v5 = vmax.f32 %v853_v29, %v972_v63 }
 0x13c   : > { %v979_v6 = vmax.f32 %v852_v30, %v971_v2  ;;  %v981_v7 = vmax.f32 %v854_v31, %v973_v3  ;;  %v1041_v8 = vpop.f32.mrb[16].mxu0  ;;  %v1084_v9 = vpop.f32.mrb[16].mxu1 }
 0x13d   : > { %v1042_v10 = vadd.f32 %v1041_v8, %v2581_v32  ;;  %v1085_v11 = vadd.f32 %v1084_v9, %v2583_v33  ;;  %v1043_v12 = vpop.f32.mrb[17].mxu0  ;;  %v1086_v13 = vpop.f32.mrb[17].mxu1 }
 0x13e   : > { %v1044_v14 = vadd.f32 %v1043_v12, %v2585_v34  ;;  %v1087_v15 = vadd.f32 %v1086_v13, %v2587_v35  ;;  %v1045_v16 = vpop.f32.mrb[18].mxu0  ;;  %v1088_v17 = vpop.f32.mrb[18].mxu1 }
 0x13f   : > { %v1093_v18 = vmax.f32 %v1042_v10, 0.0  ;;  %v1095_v19 = vmax.f32 %v1085_v11, 0.0  ;;  %v1046_v20 = vadd.f32 %v1045_v16, %v2589_v38  ;;  %v1089_v21 = vadd.f32 %v1088_v17, %v2591_v39  ;;  %v1047_v22 = vpop.f32.mrb[19].mxu0  ;;  %v1090_v23 = vpop.f32.mrb[19].mxu1 }
 0x140   : > { %v1094_v24 = vmax.f32 %v1044_v14, 0.0  ;;  %v1096_v25 = vmax.f32 %v1087_v15, 0.0  ;;  %v1048_v26 = vadd.f32 %v1047_v22, %v2595_v44  ;;  %v1091_v27 = vadd.f32 %v1090_v23, %v2597_v45 }
 0x141   : > { %v1101_v28 = vmax.f32 %v974_v60, %v1093_v18  ;;  %v1103_v29 = vmax.f32 %v976_v61, %v1095_v19  ;;  %v1097_v30 = vmax.f32 %v1046_v20, 0.0  ;;  %v1099_v31 = vmax.f32 %v1089_v21, 0.0 }
 0x142   : > { %v1102_v36 = vmax.f32 %v975_v0, %v1094_v24  ;;  %v1104_v37 = vmax.f32 %v977_v1, %v1096_v25  ;;  %v1098_v40 = vmax.f32 %v1048_v26, 0.0  ;;  %v1100_v41 = vmax.f32 %v1091_v27, 0.0 }
 0x143   : > { %v1105_v42 = vmax.f32 %v978_v4, %v1097_v30  ;;  %v1107_v43 = vmax.f32 %v980_v5, %v1099_v31 }
 0x144   : > { %v1106_v46 = vmax.f32 %v979_v6, %v1098_v40  ;;  %v1108_v47 = vmax.f32 %v981_v7, %v1100_v41  ;;  %v1168_v48 = vpop.f32.mrb[20].mxu0  ;;  %v1211_v49 = vpop.f32.mrb[20].mxu1 }
 0x145   : > { %v1169_v50 = vadd.f32 %v1168_v48, %v2581_v32  ;;  %v1212_v51 = vadd.f32 %v1211_v49, %v2583_v33  ;;  %v1170_v52 = vpop.f32.mrb[21].mxu0  ;;  %v1213_v53 = vpop.f32.mrb[21].mxu1 }
 0x146   : > { %v1171_v54 = vadd.f32 %v1170_v52, %v2585_v34  ;;  %v1214_v55 = vadd.f32 %v1213_v53, %v2587_v35  ;;  %v1172_v56 = vpop.f32.mrb[22].mxu0  ;;  %v1215_v57 = vpop.f32.mrb[22].mxu1 }
 0x147   : > { %v1220_v58 = vmax.f32 %v1169_v50, 0.0  ;;  %v1222_v59 = vmax.f32 %v1212_v51, 0.0  ;;  %v1173_v60 = vadd.f32 %v1172_v56, %v2589_v38  ;;  %v1216_v61 = vadd.f32 %v1215_v57, %v2591_v39  ;;  %v1174_v62 = vpop.f32.mrb[23].mxu0  ;;  %v1217_v63 = vpop.f32.mrb[23].mxu1 }
 0x148   : > { %v1221_v0 = vmax.f32 %v1171_v54, 0.0  ;;  %v1223_v1 = vmax.f32 %v1214_v55, 0.0  ;;  %v1175_v2 = vadd.f32 %v1174_v62, %v2595_v44  ;;  %v1218_v3 = vadd.f32 %v1217_v63, %v2597_v45 }
 0x149   : > { %v1228_v4 = vmax.f32 %v1101_v28, %v1220_v58  ;;  %v1230_v5 = vmax.f32 %v1103_v29, %v1222_v59  ;;  %v1224_v6 = vmax.f32 %v1173_v60, 0.0  ;;  %v1226_v7 = vmax.f32 %v1216_v61, 0.0 }
 0x14a   : > { %v1229_v8 = vmax.f32 %v1102_v36, %v1221_v0  ;;  %v1231_v9 = vmax.f32 %v1104_v37, %v1223_v1  ;;  %v1225_v10 = vmax.f32 %v1175_v2, 0.0  ;;  %v1227_v11 = vmax.f32 %v1218_v3, 0.0 }
 0x14b   : > { %v1232_v12 = vmax.f32 %v1105_v42, %v1224_v6  ;;  %v1234_v13 = vmax.f32 %v1107_v43, %v1226_v7 }
 0x14c   : > { %v1233_v14 = vmax.f32 %v1106_v46, %v1225_v10  ;;  %v1235_v15 = vmax.f32 %v1108_v47, %v1227_v11  ;;  %v1295_v16 = vpop.f32.mrb[24].mxu0  ;;  %v1338_v17 = vpop.f32.mrb[24].mxu1 }
 0x14d   : > { %v1296_v18 = vadd.f32 %v1295_v16, %v2581_v32  ;;  %v1339_v19 = vadd.f32 %v1338_v17, %v2583_v33  ;;  %v1297_v20 = vpop.f32.mrb[25].mxu0  ;;  %v1340_v21 = vpop.f32.mrb[25].mxu1 }
 0x14e   : > { %v1298_v22 = vadd.f32 %v1297_v20, %v2585_v34  ;;  %v1341_v23 = vadd.f32 %v1340_v21, %v2587_v35  ;;  %v1299_v24 = vpop.f32.mrb[26].mxu0  ;;  %v1342_v25 = vpop.f32.mrb[26].mxu1 }
 0x14f   : > { %v1347_v26 = vmax.f32 %v1296_v18, 0.0  ;;  %v1349_v27 = vmax.f32 %v1339_v19, 0.0  ;;  %v1300_v28 = vadd.f32 %v1299_v24, %v2589_v38  ;;  %v1343_v29 = vadd.f32 %v1342_v25, %v2591_v39  ;;  %v1301_v30 = vpop.f32.mrb[27].mxu0  ;;  %v1344_v31 = vpop.f32.mrb[27].mxu1 }
 0x150   : > { %v1348_v36 = vmax.f32 %v1298_v22, 0.0  ;;  %v1350_v37 = vmax.f32 %v1341_v23, 0.0  ;;  %v1302_v40 = vadd.f32 %v1301_v30, %v2595_v44  ;;  %v1345_v41 = vadd.f32 %v1344_v31, %v2597_v45 }
 0x151   : > { %v1355_v42 = vmax.f32 %v1228_v4, %v1347_v26  ;;  %v1357_v43 = vmax.f32 %v1230_v5, %v1349_v27  ;;  %v1351_v46 = vmax.f32 %v1300_v28, 0.0  ;;  %v1353_v47 = vmax.f32 %v1343_v29, 0.0 }
 0x152   : > { %v1356_v48 = vmax.f32 %v1229_v8, %v1348_v36  ;;  %v1358_v49 = vmax.f32 %v1231_v9, %v1350_v37  ;;  %v1352_v50 = vmax.f32 %v1302_v40, 0.0  ;;  %v1354_v51 = vmax.f32 %v1345_v41, 0.0 }
 0x153   : > { %v1359_v52 = vmax.f32 %v1232_v12, %v1351_v46  ;;  %v1361_v53 = vmax.f32 %v1234_v13, %v1353_v47 }
 0x154   : > { %v1360_v54 = vmax.f32 %v1233_v14, %v1352_v50  ;;  %v1362_v55 = vmax.f32 %v1235_v15, %v1354_v51  ;;  %v1422_v56 = vpop.f32.mrb[28].mxu0  ;;  %v1465_v57 = vpop.f32.mrb[28].mxu1 }
 0x155   : > { %v1423_v58 = vadd.f32 %v1422_v56, %v2581_v32  ;;  %v1466_v59 = vadd.f32 %v1465_v57, %v2583_v33  ;;  %v1424_v60 = vpop.f32.mrb[29].mxu0  ;;  %v1467_v61 = vpop.f32.mrb[29].mxu1 }
 0x156   : > { %v1425_v62 = vadd.f32 %v1424_v60, %v2585_v34  ;;  %v1468_v63 = vadd.f32 %v1467_v61, %v2587_v35  ;;  %v1426_v0 = vpop.f32.mrb[30].mxu0  ;;  %v1469_v1 = vpop.f32.mrb[30].mxu1 }
 0x157   : > { %v1474_v2 = vmax.f32 %v1423_v58, 0.0  ;;  %v1476_v3 = vmax.f32 %v1466_v59, 0.0  ;;  %v1427_v4 = vadd.f32 %v1426_v0, %v2589_v38  ;;  %v1470_v5 = vadd.f32 %v1469_v1, %v2591_v39  ;;  %v1428_v6 = vpop.f32.mrb[31].mxu0  ;;  %v1471_v7 = vpop.f32.mrb[31].mxu1 }
 0x158   : > { %v1475_v8 = vmax.f32 %v1425_v62, 0.0  ;;  %v1477_v9 = vmax.f32 %v1468_v63, 0.0  ;;  %v1429_v10 = vadd.f32 %v1428_v6, %v2595_v44  ;;  %v1472_v11 = vadd.f32 %v1471_v7, %v2597_v45 }
 0x159   : > { %v1482_v12 = vmax.f32 %v1355_v42, %v1474_v2  ;;  %v1484_v13 = vmax.f32 %v1357_v43, %v1476_v3  ;;  %v1478_v14 = vmax.f32 %v1427_v4, 0.0  ;;  %v1480_v15 = vmax.f32 %v1470_v5, 0.0 }
 0x15a   : > { %v1483_v16 = vmax.f32 %v1356_v48, %v1475_v8  ;;  %v1485_v17 = vmax.f32 %v1358_v49, %v1477_v9  ;;  %v1479_v18 = vmax.f32 %v1429_v10, 0.0  ;;  %v1481_v19 = vmax.f32 %v1472_v11, 0.0 }
 0x15b   : > { %v1486_v20 = vmax.f32 %v1359_v52, %v1478_v14  ;;  %v1488_v21 = vmax.f32 %v1361_v53, %v1480_v15 }
 0x15c   : > { %v1487_v22 = vmax.f32 %v1360_v54, %v1479_v18  ;;  %v1489_v23 = vmax.f32 %v1362_v55, %v1481_v19  ;;  %v1549_v24 = vpop.f32.mrb[32].mxu0  ;;  %v1592_v25 = vpop.f32.mrb[32].mxu1 }
 0x15d   : > { %v1550_v26 = vadd.f32 %v1549_v24, %v2581_v32  ;;  %v1593_v27 = vadd.f32 %v1592_v25, %v2583_v33  ;;  %v1551_v28 = vpop.f32.mrb[33].mxu0  ;;  %v1594_v29 = vpop.f32.mrb[33].mxu1 }
 0x15e   : > { %v1552_v30 = vadd.f32 %v1551_v28, %v2585_v34  ;;  %v1595_v31 = vadd.f32 %v1594_v29, %v2587_v35  ;;  %v1553_v36 = vpop.f32.mrb[34].mxu0  ;;  %v1596_v37 = vpop.f32.mrb[34].mxu1 }
 0x15f   : > { %v1601_v40 = vmax.f32 %v1550_v26, 0.0  ;;  %v1603_v41 = vmax.f32 %v1593_v27, 0.0  ;;  %v1554_v42 = vadd.f32 %v1553_v36, %v2589_v38  ;;  %v1597_v43 = vadd.f32 %v1596_v37, %v2591_v39  ;;  %v1555_v46 = vpop.f32.mrb[35].mxu0  ;;  %v1598_v32 = vpop.f32.mrb[35].mxu1 }
 0x160   : > { %v1602_v33 = vmax.f32 %v1552_v30, 0.0  ;;  %v1604_v47 = vmax.f32 %v1595_v31, 0.0  ;;  %v1556_v48 = vadd.f32 %v1555_v46, %v2595_v44  ;;  %v1599_v34 = vadd.f32 %v1598_v32, %v2597_v45 }
 0x161   : > { %v1605_v35 = vmax.f32 %v1554_v42, 0.0  ;;  %v1607_v49 = vmax.f32 %v1597_v43, 0.0  ;;  %v1609_v50 = vmax.f32 %v1482_v12, %v1601_v40  ;;  %v1611_v51 = vmax.f32 %v1484_v13, %v1603_v41 }
 0x162   : > { %v1606_v52 = vmax.f32 %v1556_v48, 0.0  ;;  %v1608_v53 = vmax.f32 %v1599_v34, 0.0  ;;  %v1610_v38 = vmax.f32 %v1483_v16, %v1602_v33  ;;  %v1612_v54 = vmax.f32 %v1485_v17, %v1604_v47 }
 0x163   : > { %v1613_v39 = vmax.f32 %v1486_v20, %v1605_v35  ;;  %v1615_v55 = vmax.f32 %v1488_v21, %v1607_v49 }
 0x164   : > { %v1687_v56 = vpop.f32.mrb[36].mxu0  ;;  %v1730_v57 = vpop.f32.mrb[36].mxu1  ;;  %v1614_v58 = vmax.f32 %v1487_v22, %v1606_v52  ;;  %v1616_v44 = vmax.f32 %v1489_v23, %v1608_v53 }
 0x165   : > { %v1739_v45 = vadd.f32 %v1687_v56, %v1609_v50  ;;  %v1741_v59 = vadd.f32 %v1730_v57, %v1611_v51  ;;  %v1689_v60 = vpop.f32.mrb[37].mxu0  ;;  %v1732_v61 = vpop.f32.mrb[37].mxu1 }
 0x166   : > { %v1740_v62 = vadd.f32 %v1689_v60, %v1610_v38  ;;  %v1742_v63 = vadd.f32 %v1732_v61, %v1612_v54  ;;  %v1691_v0 = vpop.f32.mrb[38].mxu0  ;;  %v1734_v1 = vpop.f32.mrb[38].mxu1 }
 0x167   : > { %v1747_v2 = vmax.f32 %v1739_v45, 0.0  ;;  %v1749_v3 = vmax.f32 %v1741_v59, 0.0  ;;  %v1743_v4 = vadd.f32 %v1691_v0, %v1613_v39  ;;  %v1745_v5 = vadd.f32 %v1734_v1, %v1615_v55  ;;  %v1693_v6 = vpop.f32.mrb[39].mxu0  ;;  %v1736_v7 = vpop.f32.mrb[39].mxu1 }
 0x168   : > { %v1748_v8 = vmax.f32 %v1740_v62, 0.0  ;;  %v1750_v9 = vmax.f32 %v1742_v63, 0.0  ;;  %v1744_v10 = vadd.f32 %v1693_v6, %v1614_v58  ;;  %v1746_v11 = vadd.f32 %v1736_v7, %v1616_v44 }
 0x169   : > { %1755 = vst [vmem:[%s2666_s28] sm:$0xff] %v1747_v2  ;;  %1757 = vst [vmem:[%s2666_s28 + $0x10] sm:$0xff] %v1749_v3  ;;  %v1751_v12 = vmax.f32 %v1743_v4, 0.0  ;;  %v1753_v13 = vmax.f32 %v1745_v5, 0.0 }
 0x16a   : > { %1756 = vst [vmem:[%s2666_s28 + $0x8] sm:$0xff] %v1748_v8  ;;  %1758 = vst [vmem:[%s2666_s28 + $0x18] sm:$0xff] %v1750_v9  ;;  %v1752_v14 = vmax.f32 %v1744_v10, 0.0  ;;  %v1754_v15 = vmax.f32 %v1746_v11, 0.0 }
 0x16b   : > { %1759 = vst [vmem:[%s2666_s28 + $0x20] sm:$0xff] %v1751_v12  ;;  %1761 = vst [vmem:[%s2666_s28 + $0x30] sm:$0xff] %v1753_v13 }
 0x16c   : > { %1760 = vst [vmem:[%s2666_s28 + $0x28] sm:$0xff] %v1752_v14  ;;  %1762 = vst [vmem:[%s2666_s28 + $0x38] sm:$0xff] %v1754_v15 }
 0x16d   : > { %2171 = shalt.err (!%p2168_p11)
}
 0x16e   : > { %s2172_s0 = scalar_lea.hbm %s2675_s10, 1024  ;;  %s2176_s22 = scalar_lea.hbm %s2744_s7, 4096 }
 0x16f   : > { %p2173_p12 = scmp.ne.s32.totalorder %s2675_s10, %s2172_s0  ;;  %p2177_p1 = scmp.lt.u32.totalorder %s2675_s10, %s2744_s7 }
 0x170   : > { %p2178_p2 = scmp.lt.u32.totalorder %s2176_s22, %s2172_s0  ;;  %p2180_p4 = scmp.lt.u32.totalorder %s2172_s0, %s2675_s10 }
 0x171   : > { %p2174_p13 = pnand %p2173_p12, %p2359_p8 }
 0x172   : > { %p2179_p3 = por %p2178_p2, %p2177_p1 }
 0x173   : > { %p2175_p0 = pneg %p2174_p13 }
 0x174   : > { %p2181_p5 = por %p2180_p4, %p2179_p3 }
 0x176   : > { %p2182_p6 = pnand %p2181_p5, %p2175_p0 }
 0x178   : > { %2185 = shalt.err (!%p2182_p6)
}
 0x179   : > { %s2256_s17 = smov 512   ;;  %s2257_s23 = smov 1024  }
 0x17a   : > { %s2258_s18 = smov 32  }
 0x17b   : > { %2021 = dma.vmem_to_hbm [thread:$0]  (%p2359_p8), %s2670_s21, 1024, %s2675_s10, %s1764_s13, %s2256_s17, %s2257_s23, %s2258_s18  }
 0x17c PF: > { %p2027_p7 = scmp.ge.s32.totalorder %s2252_s8, 2  ;;  %s1794_s19 = sand.u32 1, %s2224_s24  }
 0x17d   : > { %s1795_s0 = scalar_lea.sflag [#allocation5], %s1794_s19 }
 0x17e   : > { %p2024_p10 = pnand %p2027_p7, %p2363_p9 }
 0x180   : > { %2219 = dma.done.wait (!%p2024_p10), %s1795_s0, 1024  }
 0x181   : > { %2221 = vsyncadd (!%p2024_p10), %s1795_s0, 4294966272  ;;  %s20_s8 = sadd.s32 1, %s2252_s8   ;;  %s2752_s15 = sld [smem:[#allocation7_spill]] }
 0x182   : > { %p17_p11 = scmp.ge.s32.totalorder %s20_s8, 6   ;;  %s2753_s24 = smov %s2228_s25 }
 0x183   : > { %s2754_s25 = smov %s2232_s26  ;;  %s2755_s26 = smov %s2371_s20 }
 0x184   : > { %s2756_s27 = smov %s2244_s29  ;;  %s2757_s28 = smov %s2248_s30 }
 0x185   : > { %s2758_s29 = smov %s2761_s11  ;;  %19 = sbr.rel (!%p17_p11) target bundleno = 7 (0x7), region = 152 }
 0x187   : > { %s2759_s30 = smov %s2752_s15 }
 0x18c   :  { %1800 = vsyncpa [#allocation5], 1 }
 0x18d   :  { %1802 = vsyncpa [#allocation5 + $0x1], 1 }

</bundles_post_ra>
